<compile_context>
chip_gen: v5e
topology: v5e:2x2
jax: 0.10.0
libtpu: 0.0.40
codegen_flags: <defaults>
</compile_context>

<pallas_src>
import jax
import jax.numpy as jnp
from jax.experimental import pallas as pl
from jax.experimental.pallas import tpu as pltpu

LANES = 128


def stock_lstm_kernel(x_ref,                       # (T*B, I)  row = t*B + b
                      wih0_ref, whh0_ref, b0_ref,  # (I,4H), (H,4H), (1,4H)
                      wih1_ref, whh1_ref, b1_ref,  # (H,4H), (H,4H), (1,4H)
                      w_hid_ref, b_hid_ref,        # (H, 128), (1, 128)  lane-padded
                      w_out_ref, b_out_ref,        # (128, 128), (1, 128) lane-padded
                      out_ref,                     # (B, 128)  col 0 is the real output
                      gx0_ref):                    # VMEM scratch (T*B, 4H)
    TB = x_ref.shape[0]
    B = out_ref.shape[0]
    T = TB // B
    H = whh0_ref.shape[0]

    # ---- Hoisted layer-0 input projection + fused bias: one batched matmul.
    gx0_ref[...] = (jnp.dot(x_ref[...], wih0_ref[...],
                            preferred_element_type=jnp.float32)
                    + b0_ref[...])

    whh0 = whh0_ref[...]
    wih1 = wih1_ref[...]
    whh1 = whh1_ref[...]
    # Hoisted bias broadcast (broadcast_in_dim is not CSE'd if left in-loop).
    b1b = jnp.broadcast_to(b1_ref[...], (B, 4 * H))

    def gates(pre):
        # Full 128-lane sigmoid + tanh (2 EUP passes per cell), then lane
        # slices for the PyTorch gate order i, f, g, o.
        sg = jax.nn.sigmoid(pre)
        th = jnp.tanh(pre)
        return (sg[:, 0 * H:1 * H], sg[:, 1 * H:2 * H],
                th[:, 2 * H:3 * H], sg[:, 3 * H:4 * H])

    zeros = jnp.zeros((B, H), jnp.float32)
    h0, c0, h1, c1 = zeros, zeros, zeros, zeros

    # T is static -> full unroll.  Only the h @ W_hh matmuls remain on the
    # recurrent critical path; layer-0[t+1] and layer-1[t] are independent
    # and can be overlapped by the scheduler.
    for t in range(T):
        # ---- layer 0
        pre0 = (gx0_ref[t * B:(t + 1) * B, :]
                + jnp.dot(h0, whh0, preferred_element_type=jnp.float32))
        i, f, g, o = gates(pre0)
        c0 = f * c0 + i * g
        h0 = o * jnp.tanh(c0)
        # TODO(synk): nn.LSTM inter-layer dropout is train-only; identity here.
        # ---- layer 1
        pre1 = (jnp.dot(h0, wih1, preferred_element_type=jnp.float32)
                + jnp.dot(h1, whh1, preferred_element_type=jnp.float32)
                + b1b)
        i, f, g, o = gates(pre1)
        c1 = f * c1 + i * g
        h1 = o * jnp.tanh(c1)

    # Dropout on h_n[-1] is identity in eval mode.  Head is lane-padded to
    # 128 so both matmuls and the final store are lane-dense.
    hid = jnp.maximum(
        jnp.dot(h1, w_hid_ref[...], preferred_element_type=jnp.float32)
        + b_hid_ref[...], 0.0)
    out_ref[...] = (jnp.dot(hid, w_out_ref[...],
                            preferred_element_type=jnp.float32)
                    + b_out_ref[...])


def stock_lstm_forward(x, params):
    """x: (B, T, I) batch_first, like the PyTorch module. Returns (B, O)."""
    B, T, I = x.shape
    H = params["whh0"].shape[0]
    Hh = params["w_hid"].shape[1]
    O = params["w_out"].shape[1]

    # Time-major flattening: row index = t*B + b.
    x_flat = jnp.transpose(x, (1, 0, 2)).reshape(T * B, I)

    # Lane-pad the MLP head (zero columns/rows do not change the result).
    w_hid_p = jnp.zeros((H, LANES), jnp.float32).at[:, :Hh].set(params["w_hid"])
    b_hid_p = jnp.zeros((1, LANES), jnp.float32).at[:, :Hh].set(params["b_hid"])
    w_out_p = jnp.zeros((LANES, LANES), jnp.float32).at[:Hh, :O].set(params["w_out"])
    b_out_p = jnp.zeros((1, LANES), jnp.float32).at[:, :O].set(params["b_out"])

    operands = (
        x_flat,
        params["wih0"], params["whh0"], params["b0"],
        params["wih1"], params["whh1"], params["b1"],
        w_hid_p, b_hid_p, w_out_p, b_out_p,
    )
    vmem = pl.BlockSpec(memory_space=pltpu.MemorySpace.VMEM)
    out_padded = pl.pallas_call(
        stock_lstm_kernel,
        out_shape=jax.ShapeDtypeStruct((B, LANES), jnp.float32),
        in_specs=[vmem] * len(operands),
        out_specs=vmem,
        scratch_shapes=[pltpu.VMEM((T * B, 4 * H), jnp.float32)],
    )(*operands)
    return out_padded[:, :O]


def init_params(key, input_size, hidden, output_size):
    """Deterministic PyTorch-style uniform(-1/sqrt(H), 1/sqrt(H)) init."""
    k = 1.0 / jnp.sqrt(hidden)
    keys = jax.random.split(key, 14)

    def u(kk, shape):
        return jax.random.uniform(kk, shape, jnp.float32, -k, k)

    H, I, O = hidden, input_size, output_size
    Hh = H // 2
    # LSTM weights stored pre-transposed for x @ W; biases b_ih + b_hh fused.
    params = {
        "wih0": u(keys[0], (I, 4 * H)),
        "whh0": u(keys[1], (H, 4 * H)),
        "b0": (u(keys[2], (1, 4 * H)) + u(keys[3], (1, 4 * H))),
        "wih1": u(keys[4], (H, 4 * H)),
        "whh1": u(keys[5], (H, 4 * H)),
        "b1": (u(keys[6], (1, 4 * H)) + u(keys[7], (1, 4 * H))),
        "w_hid": u(keys[8], (H, Hh)),
        "b_hid": u(keys[9], (1, Hh)),
        "w_out": u(keys[10], (Hh, O)),
        "b_out": u(keys[11], (1, O)),
    }
    return params


def reference_forward(x, params):
    """Pure-JAX reference mirroring the PyTorch forward (eval mode)."""
    B, T, I = x.shape
    H = params["whh0"].shape[0]

    def cell(xt, h, c, wih, whh, b):
        g = xt @ wih + h @ whh + b
        i = jax.nn.sigmoid(g[:, 0 * H:1 * H])
        f = jax.nn.sigmoid(g[:, 1 * H:2 * H])
        gg = jnp.tanh(g[:, 2 * H:3 * H])
        o = jax.nn.sigmoid(g[:, 3 * H:4 * H])
        c = f * c + i * gg
        return o * jnp.tanh(c), c

    h0 = c0 = h1 = c1 = jnp.zeros((B, H), jnp.float32)
    for t in range(T):
        xt = x[:, t, :]
        h0, c0 = cell(xt, h0, c0, params["wih0"], params["whh0"], params["b0"])
        h1, c1 = cell(h0, h1, c1, params["wih1"], params["whh1"], params["b1"])
    hid = jnp.maximum(h1 @ params["w_hid"] + params["b_hid"], 0.0)
    return hid @ params["w_out"] + params["b_out"]


if __name__ == "__main__":
    # Small shapes consistent with the module: batch=2, seq=8, input_size=4,
    # hidden_layer_size=32, output_size=1.
    B, T, I, H, O = 2, 8, 4, 32, 1

    key = jax.random.PRNGKey(0)
    kx, kp = jax.random.split(key)
    x = jax.random.normal(kx, (B, T, I), jnp.float32)
    params = init_params(kp, I, H, O)

    out = stock_lstm_forward(x, params)
    out = jax.block_until_ready(out)

    ref = reference_forward(x, params)
    assert out.shape == (B, O)
    assert jnp.allclose(out, ref, atol=1e-5, rtol=1e-5), (out, ref)

    print("KERNEL_OK")
</pallas_src>

<mosaic_0001>
module attributes {stable_mosaic.version = 11 : i64} {
  func.func @stock_lstm_kernel(%arg0: memref<16x4xf32, #tpu.memory_space<vmem>>, %arg1: memref<4x128xf32, #tpu.memory_space<vmem>>, %arg2: memref<32x128xf32, #tpu.memory_space<vmem>>, %arg3: memref<1x128xf32, #tpu.memory_space<vmem>>, %arg4: memref<32x128xf32, #tpu.memory_space<vmem>>, %arg5: memref<32x128xf32, #tpu.memory_space<vmem>>, %arg6: memref<1x128xf32, #tpu.memory_space<vmem>>, %arg7: memref<32x128xf32, #tpu.memory_space<vmem>>, %arg8: memref<1x128xf32, #tpu.memory_space<vmem>>, %arg9: memref<128x128xf32, #tpu.memory_space<vmem>>, %arg10: memref<1x128xf32, #tpu.memory_space<vmem>>, %arg11: memref<2x128xf32, #tpu.memory_space<vmem>>, %arg12: memref<16x128xf32, #tpu.memory_space<vmem>>) attributes {dimension_semantics = [], scalar_prefetch = 0 : i64, scratch_operands = 1 : i64, tpu.core_type = #tpu.core_type<tc>} {
    %c0 = arith.constant 0 : index
    %c0_0 = arith.constant 0 : index
    %0 = vector.load %arg0[%c0, %c0_0] : memref<16x4xf32, #tpu.memory_space<vmem>>, vector<16x4xf32>
    %c0_1 = arith.constant 0 : index
    %c0_2 = arith.constant 0 : index
    %1 = vector.load %arg1[%c0_1, %c0_2] : memref<4x128xf32, #tpu.memory_space<vmem>>, vector<4x128xf32>
    %cst = arith.constant dense<0.000000e+00> : vector<16x128xf32>
    %2 = tpu.matmul %0, %1, %cst {dimension_numbers = #tpu.dot_dimension_numbers<[1], [0], [0], [1], [0, 0, 1, 1], [], []>} : vector<16x4xf32>, vector<4x128xf32>, vector<16x128xf32> -> vector<16x128xf32>
    %c0_3 = arith.constant 0 : index
    %c0_4 = arith.constant 0 : index
    %3 = vector.load %arg3[%c0_3, %c0_4] : memref<1x128xf32, #tpu.memory_space<vmem>>, vector<1x128xf32>
    %4 = vector.broadcast %3 : vector<1x128xf32> to vector<16x128xf32>
    %5 = arith.addf %2, %4 : vector<16x128xf32>
    %c0_5 = arith.constant 0 : index
    %c0_6 = arith.constant 0 : index
    %6 = vector.load %arg12[%c0_5, %c0_6] : memref<16x128xf32, #tpu.memory_space<vmem>>, vector<16x128xf32>
    tpu.vector_store %arg12[%c0_5, %c0_6], %5 {strides = array<i32>} : memref<16x128xf32, #tpu.memory_space<vmem>>, vector<16x128xf32>,
    %c0_7 = arith.constant 0 : index
    %c0_8 = arith.constant 0 : index
    %7 = vector.load %arg2[%c0_7, %c0_8] : memref<32x128xf32, #tpu.memory_space<vmem>>, vector<32x128xf32>
    %c0_9 = arith.constant 0 : index
    %c0_10 = arith.constant 0 : index
    %8 = vector.load %arg4[%c0_9, %c0_10] : memref<32x128xf32, #tpu.memory_space<vmem>>, vector<32x128xf32>
    %c0_11 = arith.constant 0 : index
    %c0_12 = arith.constant 0 : index
    %9 = vector.load %arg5[%c0_11, %c0_12] : memref<32x128xf32, #tpu.memory_space<vmem>>, vector<32x128xf32>
    %c0_13 = arith.constant 0 : index
    %c0_14 = arith.constant 0 : index
    %10 = vector.load %arg6[%c0_13, %c0_14] : memref<1x128xf32, #tpu.memory_space<vmem>>, vector<1x128xf32>
    %11 = vector.shape_cast %10 : vector<1x128xf32> to vector<1x128xf32>
    %12 = vector.broadcast %11 : vector<1x128xf32> to vector<2x128xf32>
    %cst_15 = arith.constant 0.000000e+00 : f32
    %13 = vector.broadcast %cst_15 : f32 to vector<2x32xf32>
    %c0_16 = arith.constant 0 : index
    %c0_17 = arith.constant 0 : index
    %14 = vector.load %arg12[%c0_16, %c0_17] : memref<16x128xf32, #tpu.memory_space<vmem>>, vector<2x128xf32>
    %cst_18 = arith.constant dense<0.000000e+00> : vector<2x128xf32>
    %15 = tpu.matmul %13, %7, %cst_18 {dimension_numbers = #tpu.dot_dimension_numbers<[1], [0], [0], [1], [0, 0, 1, 1], [], []>} : vector<2x32xf32>, vector<32x128xf32>, vector<2x128xf32> -> vector<2x128xf32>
    %16 = arith.addf %14, %15 : vector<2x128xf32>
    %17 = arith.negf %16 : vector<2x128xf32>
    %18 = math.exp %17 : vector<2x128xf32>
    %cst_19 = arith.constant 1.000000e+00 : f32
    %19 = vector.broadcast %cst_19 : f32 to vector<2x128xf32>
    %20 = arith.addf %19, %18 : vector<2x128xf32>
    %21 = arith.divf %19, %20 : vector<2x128xf32>
    %22 = math.tanh %16 : vector<2x128xf32>
    %23 = vector.extract_strided_slice %21 {offsets = [0, 0], sizes = [2, 32], strides = [1, 1]} : vector<2x128xf32> to vector<2x32xf32>
    %24 = vector.extract_strided_slice %21 {offsets = [0, 32], sizes = [2, 32], strides = [1, 1]} : vector<2x128xf32> to vector<2x32xf32>
    %25 = vector.extract_strided_slice %22 {offsets = [0, 64], sizes = [2, 32], strides = [1, 1]} : vector<2x128xf32> to vector<2x32xf32>
    %26 = vector.extract_strided_slice %21 {offsets = [0, 96], sizes = [2, 32], strides = [1, 1]} : vector<2x128xf32> to vector<2x32xf32>
    %27 = arith.mulf %24, %13 : vector<2x32xf32>
    %28 = arith.mulf %23, %25 : vector<2x32xf32>
    %29 = arith.addf %27, %28 : vector<2x32xf32>
    %30 = math.tanh %29 : vector<2x32xf32>
    %31 = arith.mulf %26, %30 : vector<2x32xf32>
    %cst_20 = arith.constant dense<0.000000e+00> : vector<2x128xf32>
    %32 = tpu.matmul %31, %8, %cst_20 {dimension_numbers = #tpu.dot_dimension_numbers<[1], [0], [0], [1], [0, 0, 1, 1], [], []>} : vector<2x32xf32>, vector<32x128xf32>, vector<2x128xf32> -> vector<2x128xf32>
    %cst_21 = arith.constant dense<0.000000e+00> : vector<2x128xf32>
    %33 = tpu.matmul %13, %9, %cst_21 {dimension_numbers = #tpu.dot_dimension_numbers<[1], [0], [0], [1], [0, 0, 1, 1], [], []>} : vector<2x32xf32>, vector<32x128xf32>, vector<2x128xf32> -> vector<2x128xf32>
    %34 = arith.addf %32, %33 : vector<2x128xf32>
    %35 = arith.addf %34, %12 : vector<2x128xf32>
    %36 = arith.negf %35 : vector<2x128xf32>
    %37 = math.exp %36 : vector<2x128xf32>
    %cst_22 = arith.constant 1.000000e+00 : f32
    %38 = vector.broadcast %cst_22 : f32 to vector<2x128xf32>
    %39 = arith.addf %38, %37 : vector<2x128xf32>
    %40 = arith.divf %38, %39 : vector<2x128xf32>
    %41 = math.tanh %35 : vector<2x128xf32>
    %42 = vector.extract_strided_slice %40 {offsets = [0, 0], sizes = [2, 32], strides = [1, 1]} : vector<2x128xf32> to vector<2x32xf32>
    %43 = vector.extract_strided_slice %40 {offsets = [0, 32], sizes = [2, 32], strides = [1, 1]} : vector<2x128xf32> to vector<2x32xf32>
    %44 = vector.extract_strided_slice %41 {offsets = [0, 64], sizes = [2, 32], strides = [1, 1]} : vector<2x128xf32> to vector<2x32xf32>
    %45 = vector.extract_strided_slice %40 {offsets = [0, 96], sizes = [2, 32], strides = [1, 1]} : vector<2x128xf32> to vector<2x32xf32>
    %46 = arith.mulf %43, %13 : vector<2x32xf32>
    %47 = arith.mulf %42, %44 : vector<2x32xf32>
    %48 = arith.addf %46, %47 : vector<2x32xf32>
    %49 = math.tanh %48 : vector<2x32xf32>
    %50 = arith.mulf %45, %49 : vector<2x32xf32>
    %c2 = arith.constant 2 : index
    %c0_23 = arith.constant 0 : index
    %51 = vector.load %arg12[%c2, %c0_23] : memref<16x128xf32, #tpu.memory_space<vmem>>, vector<2x128xf32>
    %cst_24 = arith.constant dense<0.000000e+00> : vector<2x128xf32>
    %52 = tpu.matmul %31, %7, %cst_24 {dimension_numbers = #tpu.dot_dimension_numbers<[1], [0], [0], [1], [0, 0, 1, 1], [], []>} : vector<2x32xf32>, vector<32x128xf32>, vector<2x128xf32> -> vector<2x128xf32>
    %53 = arith.addf %51, %52 : vector<2x128xf32>
    %54 = arith.negf %53 : vector<2x128xf32>
    %55 = math.exp %54 : vector<2x128xf32>
    %cst_25 = arith.constant 1.000000e+00 : f32
    %56 = vector.broadcast %cst_25 : f32 to vector<2x128xf32>
    %57 = arith.addf %56, %55 : vector<2x128xf32>
    %58 = arith.divf %56, %57 : vector<2x128xf32>
    %59 = math.tanh %53 : vector<2x128xf32>
    %60 = vector.extract_strided_slice %58 {offsets = [0, 0], sizes = [2, 32], strides = [1, 1]} : vector<2x128xf32> to vector<2x32xf32>
    %61 = vector.extract_strided_slice %58 {offsets = [0, 32], sizes = [2, 32], strides = [1, 1]} : vector<2x128xf32> to vector<2x32xf32>
    %62 = vector.extract_strided_slice %59 {offsets = [0, 64], sizes = [2, 32], strides = [1, 1]} : vector<2x128xf32> to vector<2x32xf32>
    %63 = vector.extract_strided_slice %58 {offsets = [0, 96], sizes = [2, 32], strides = [1, 1]} : vector<2x128xf32> to vector<2x32xf32>
    %64 = arith.mulf %61, %29 : vector<2x32xf32>
    %65 = arith.mulf %60, %62 : vector<2x32xf32>
    %66 = arith.addf %64, %65 : vector<2x32xf32>
    %67 = math.tanh %66 : vector<2x32xf32>
    %68 = arith.mulf %63, %67 : vector<2x32xf32>
    %cst_26 = arith.constant dense<0.000000e+00> : vector<2x128xf32>
    %69 = tpu.matmul %68, %8, %cst_26 {dimension_numbers = #tpu.dot_dimension_numbers<[1], [0], [0], [1], [0, 0, 1, 1], [], []>} : vector<2x32xf32>, vector<32x128xf32>, vector<2x128xf32> -> vector<2x128xf32>
    %cst_27 = arith.constant dense<0.000000e+00> : vector<2x128xf32>
    %70 = tpu.matmul %50, %9, %cst_27 {dimension_numbers = #tpu.dot_dimension_numbers<[1], [0], [0], [1], [0, 0, 1, 1], [], []>} : vector<2x32xf32>, vector<32x128xf32>, vector<2x128xf32> -> vector<2x128xf32>
    %71 = arith.addf %69, %70 : vector<2x128xf32>
    %72 = arith.addf %71, %12 : vector<2x128xf32>
    %73 = arith.negf %72 : vector<2x128xf32>
    %74 = math.exp %73 : vector<2x128xf32>
    %cst_28 = arith.constant 1.000000e+00 : f32
    %75 = vector.broadcast %cst_28 : f32 to vector<2x128xf32>
    %76 = arith.addf %75, %74 : vector<2x128xf32>
    %77 = arith.divf %75, %76 : vector<2x128xf32>
    %78 = math.tanh %72 : vector<2x128xf32>
    %79 = vector.extract_strided_slice %77 {offsets = [0, 0], sizes = [2, 32], strides = [1, 1]} : vector<2x128xf32> to vector<2x32xf32>
    %80 = vector.extract_strided_slice %77 {offsets = [0, 32], sizes = [2, 32], strides = [1, 1]} : vector<2x128xf32> to vector<2x32xf32>
    %81 = vector.extract_strided_slice %78 {offsets = [0, 64], sizes = [2, 32], strides = [1, 1]} : vector<2x128xf32> to vector<2x32xf32>
    %82 = vector.extract_strided_slice %77 {offsets = [0, 96], sizes = [2, 32], strides = [1, 1]} : vector<2x128xf32> to vector<2x32xf32>
    %83 = arith.mulf %80, %48 : vector<2x32xf32>
    %84 = arith.mulf %79, %81 : vector<2x32xf32>
    %85 = arith.addf %83, %84 : vector<2x32xf32>
    %86 = math.tanh %85 : vector<2x32xf32>
    %87 = arith.mulf %82, %86 : vector<2x32xf32>
    %c4 = arith.constant 4 : index
    %c0_29 = arith.constant 0 : index
    %88 = vector.load %arg12[%c4, %c0_29] : memref<16x128xf32, #tpu.memory_space<vmem>>, vector<2x128xf32>
    %cst_30 = arith.constant dense<0.000000e+00> : vector<2x128xf32>
    %89 = tpu.matmul %68, %7, %cst_30 {dimension_numbers = #tpu.dot_dimension_numbers<[1], [0], [0], [1], [0, 0, 1, 1], [], []>} : vector<2x32xf32>, vector<32x128xf32>, vector<2x128xf32> -> vector<2x128xf32>
    %90 = arith.addf %88, %89 : vector<2x128xf32>
    %91 = arith.negf %90 : vector<2x128xf32>
    %92 = math.exp %91 : vector<2x128xf32>
    %cst_31 = arith.constant 1.000000e+00 : f32
    %93 = vector.broadcast %cst_31 : f32 to vector<2x128xf32>
    %94 = arith.addf %93, %92 : vector<2x128xf32>
    %95 = arith.divf %93, %94 : vector<2x128xf32>
    %96 = math.tanh %90 : vector<2x128xf32>
    %97 = vector.extract_strided_slice %95 {offsets = [0, 0], sizes = [2, 32], strides = [1, 1]} : vector<2x128xf32> to vector<2x32xf32>
    %98 = vector.extract_strided_slice %95 {offsets = [0, 32], sizes = [2, 32], strides = [1, 1]} : vector<2x128xf32> to vector<2x32xf32>
    %99 = vector.extract_strided_slice %96 {offsets = [0, 64], sizes = [2, 32], strides = [1, 1]} : vector<2x128xf32> to vector<2x32xf32>
    %100 = vector.extract_strided_slice %95 {offsets = [0, 96], sizes = [2, 32], strides = [1, 1]} : vector<2x128xf32> to vector<2x32xf32>
    %101 = arith.mulf %98, %66 : vector<2x32xf32>
    %102 = arith.mulf %97, %99 : vector<2x32xf32>
    %103 = arith.addf %101, %102 : vector<2x32xf32>
    %104 = math.tanh %103 : vector<2x32xf32>
    %105 = arith.mulf %100, %104 : vector<2x32xf32>
    %cst_32 = arith.constant dense<0.000000e+00> : vector<2x128xf32>
    %106 = tpu.matmul %105, %8, %cst_32 {dimension_numbers = #tpu.dot_dimension_numbers<[1], [0], [0], [1], [0, 0, 1, 1], [], []>} : vector<2x32xf32>, vector<32x128xf32>, vector<2x128xf32> -> vector<2x128xf32>
    %cst_33 = arith.constant dense<0.000000e+00> : vector<2x128xf32>
    %107 = tpu.matmul %87, %9, %cst_33 {dimension_numbers = #tpu.dot_dimension_numbers<[1], [0], [0], [1], [0, 0, 1, 1], [], []>} : vector<2x32xf32>, vector<32x128xf32>, vector<2x128xf32> -> vector<2x128xf32>
    %108 = arith.addf %106, %107 : vector<2x128xf32>
    %109 = arith.addf %108, %12 : vector<2x128xf32>
    %110 = arith.negf %109 : vector<2x128xf32>
    %111 = math.exp %110 : vector<2x128xf32>
    %cst_34 = arith.constant 1.000000e+00 : f32
    %112 = vector.broadcast %cst_34 : f32 to vector<2x128xf32>
    %113 = arith.addf %112, %111 : vector<2x128xf32>
    %114 = arith.divf %112, %113 : vector<2x128xf32>
    %115 = math.tanh %109 : vector<2x128xf32>
    %116 = vector.extract_strided_slice %114 {offsets = [0, 0], sizes = [2, 32], strides = [1, 1]} : vector<2x128xf32> to vector<2x32xf32>
    %117 = vector.extract_strided_slice %114 {offsets = [0, 32], sizes = [2, 32], strides = [1, 1]} : vector<2x128xf32> to vector<2x32xf32>
    %118 = vector.extract_strided_slice %115 {offsets = [0, 64], sizes = [2, 32], strides = [1, 1]} : vector<2x128xf32> to vector<2x32xf32>
    %119 = vector.extract_strided_slice %114 {offsets = [0, 96], sizes = [2, 32], strides = [1, 1]} : vector<2x128xf32> to vector<2x32xf32>
    %120 = arith.mulf %117, %85 : vector<2x32xf32>
    %121 = arith.mulf %116, %118 : vector<2x32xf32>
    %122 = arith.addf %120, %121 : vector<2x32xf32>
    %123 = math.tanh %122 : vector<2x32xf32>
    %124 = arith.mulf %119, %123 : vector<2x32xf32>
    %c6 = arith.constant 6 : index
    %c0_35 = arith.constant 0 : index
    %125 = vector.load %arg12[%c6, %c0_35] : memref<16x128xf32, #tpu.memory_space<vmem>>, vector<2x128xf32>
    %cst_36 = arith.constant dense<0.000000e+00> : vector<2x128xf32>
    %126 = tpu.matmul %105, %7, %cst_36 {dimension_numbers = #tpu.dot_dimension_numbers<[1], [0], [0], [1], [0, 0, 1, 1], [], []>} : vector<2x32xf32>, vector<32x128xf32>, vector<2x128xf32> -> vector<2x128xf32>
    %127 = arith.addf %125, %126 : vector<2x128xf32>
    %128 = arith.negf %127 : vector<2x128xf32>
    %129 = math.exp %128 : vector<2x128xf32>
    %cst_37 = arith.constant 1.000000e+00 : f32
    %130 = vector.broadcast %cst_37 : f32 to vector<2x128xf32>
    %131 = arith.addf %130, %129 : vector<2x128xf32>
    %132 = arith.divf %130, %131 : vector<2x128xf32>
    %133 = math.tanh %127 : vector<2x128xf32>
    %134 = vector.extract_strided_slice %132 {offsets = [0, 0], sizes = [2, 32], strides = [1, 1]} : vector<2x128xf32> to vector<2x32xf32>
    %135 = vector.extract_strided_slice %132 {offsets = [0, 32], sizes = [2, 32], strides = [1, 1]} : vector<2x128xf32> to vector<2x32xf32>
    %136 = vector.extract_strided_slice %133 {offsets = [0, 64], sizes = [2, 32], strides = [1, 1]} : vector<2x128xf32> to vector<2x32xf32>
    %137 = vector.extract_strided_slice %132 {offsets = [0, 96], sizes = [2, 32], strides = [1, 1]} : vector<2x128xf32> to vector<2x32xf32>
    %138 = arith.mulf %135, %103 : vector<2x32xf32>
    %139 = arith.mulf %134, %136 : vector<2x32xf32>
    %140 = arith.addf %138, %139 : vector<2x32xf32>
    %141 = math.tanh %140 : vector<2x32xf32>
    %142 = arith.mulf %137, %141 : vector<2x32xf32>
    %cst_38 = arith.constant dense<0.000000e+00> : vector<2x128xf32>
    %143 = tpu.matmul %142, %8, %cst_38 {dimension_numbers = #tpu.dot_dimension_numbers<[1], [0], [0], [1], [0, 0, 1, 1], [], []>} : vector<2x32xf32>, vector<32x128xf32>, vector<2x128xf32> -> vector<2x128xf32>
    %cst_39 = arith.constant dense<0.000000e+00> : vector<2x128xf32>
    %144 = tpu.matmul %124, %9, %cst_39 {dimension_numbers = #tpu.dot_dimension_numbers<[1], [0], [0], [1], [0, 0, 1, 1], [], []>} : vector<2x32xf32>, vector<32x128xf32>, vector<2x128xf32> -> vector<2x128xf32>
    %145 = arith.addf %143, %144 : vector<2x128xf32>
    %146 = arith.addf %145, %12 : vector<2x128xf32>
    %147 = arith.negf %146 : vector<2x128xf32>
    %148 = math.exp %147 : vector<2x128xf32>
    %cst_40 = arith.constant 1.000000e+00 : f32
    %149 = vector.broadcast %cst_40 : f32 to vector<2x128xf32>
    %150 = arith.addf %149, %148 : vector<2x128xf32>
    %151 = arith.divf %149, %150 : vector<2x128xf32>
    %152 = math.tanh %146 : vector<2x128xf32>
    %153 = vector.extract_strided_slice %151 {offsets = [0, 0], sizes = [2, 32], strides = [1, 1]} : vector<2x128xf32> to vector<2x32xf32>
    %154 = vector.extract_strided_slice %151 {offsets = [0, 32], sizes = [2, 32], strides = [1, 1]} : vector<2x128xf32> to vector<2x32xf32>
    %155 = vector.extract_strided_slice %152 {offsets = [0, 64], sizes = [2, 32], strides = [1, 1]} : vector<2x128xf32> to vector<2x32xf32>
    %156 = vector.extract_strided_slice %151 {offsets = [0, 96], sizes = [2, 32], strides = [1, 1]} : vector<2x128xf32> to vector<2x32xf32>
    %157 = arith.mulf %154, %122 : vector<2x32xf32>
    %158 = arith.mulf %153, %155 : vector<2x32xf32>
    %159 = arith.addf %157, %158 : vector<2x32xf32>
    %160 = math.tanh %159 : vector<2x32xf32>
    %161 = arith.mulf %156, %160 : vector<2x32xf32>
    %c8 = arith.constant 8 : index
    %c0_41 = arith.constant 0 : index
    %162 = vector.load %arg12[%c8, %c0_41] : memref<16x128xf32, #tpu.memory_space<vmem>>, vector<2x128xf32>
    %cst_42 = arith.constant dense<0.000000e+00> : vector<2x128xf32>
    %163 = tpu.matmul %142, %7, %cst_42 {dimension_numbers = #tpu.dot_dimension_numbers<[1], [0], [0], [1], [0, 0, 1, 1], [], []>} : vector<2x32xf32>, vector<32x128xf32>, vector<2x128xf32> -> vector<2x128xf32>
    %164 = arith.addf %162, %163 : vector<2x128xf32>
    %165 = arith.negf %164 : vector<2x128xf32>
    %166 = math.exp %165 : vector<2x128xf32>
    %cst_43 = arith.constant 1.000000e+00 : f32
    %167 = vector.broadcast %cst_43 : f32 to vector<2x128xf32>
    %168 = arith.addf %167, %166 : vector<2x128xf32>
    %169 = arith.divf %167, %168 : vector<2x128xf32>
    %170 = math.tanh %164 : vector<2x128xf32>
    %171 = vector.extract_strided_slice %169 {offsets = [0, 0], sizes = [2, 32], strides = [1, 1]} : vector<2x128xf32> to vector<2x32xf32>
    %172 = vector.extract_strided_slice %169 {offsets = [0, 32], sizes = [2, 32], strides = [1, 1]} : vector<2x128xf32> to vector<2x32xf32>
    %173 = vector.extract_strided_slice %170 {offsets = [0, 64], sizes = [2, 32], strides = [1, 1]} : vector<2x128xf32> to vector<2x32xf32>
    %174 = vector.extract_strided_slice %169 {offsets = [0, 96], sizes = [2, 32], strides = [1, 1]} : vector<2x128xf32> to vector<2x32xf32>
    %175 = arith.mulf %172, %140 : vector<2x32xf32>
    %176 = arith.mulf %171, %173 : vector<2x32xf32>
    %177 = arith.addf %175, %176 : vector<2x32xf32>
    %178 = math.tanh %177 : vector<2x32xf32>
    %179 = arith.mulf %174, %178 : vector<2x32xf32>
    %cst_44 = arith.constant dense<0.000000e+00> : vector<2x128xf32>
    %180 = tpu.matmul %179, %8, %cst_44 {dimension_numbers = #tpu.dot_dimension_numbers<[1], [0], [0], [1], [0, 0, 1, 1], [], []>} : vector<2x32xf32>, vector<32x128xf32>, vector<2x128xf32> -> vector<2x128xf32>
    %cst_45 = arith.constant dense<0.000000e+00> : vector<2x128xf32>
    %181 = tpu.matmul %161, %9, %cst_45 {dimension_numbers = #tpu.dot_dimension_numbers<[1], [0], [0], [1], [0, 0, 1, 1], [], []>} : vector<2x32xf32>, vector<32x128xf32>, vector<2x128xf32> -> vector<2x128xf32>
    %182 = arith.addf %180, %181 : vector<2x128xf32>
    %183 = arith.addf %182, %12 : vector<2x128xf32>
    %184 = arith.negf %183 : vector<2x128xf32>
    %185 = math.exp %184 : vector<2x128xf32>
    %cst_46 = arith.constant 1.000000e+00 : f32
    %186 = vector.broadcast %cst_46 : f32 to vector<2x128xf32>
    %187 = arith.addf %186, %185 : vector<2x128xf32>
    %188 = arith.divf %186, %187 : vector<2x128xf32>
    %189 = math.tanh %183 : vector<2x128xf32>
    %190 = vector.extract_strided_slice %188 {offsets = [0, 0], sizes = [2, 32], strides = [1, 1]} : vector<2x128xf32> to vector<2x32xf32>
    %191 = vector.extract_strided_slice %188 {offsets = [0, 32], sizes = [2, 32], strides = [1, 1]} : vector<2x128xf32> to vector<2x32xf32>
    %192 = vector.extract_strided_slice %189 {offsets = [0, 64], sizes = [2, 32], strides = [1, 1]} : vector<2x128xf32> to vector<2x32xf32>
    %193 = vector.extract_strided_slice %188 {offsets = [0, 96], sizes = [2, 32], strides = [1, 1]} : vector<2x128xf32> to vector<2x32xf32>
    %194 = arith.mulf %191, %159 : vector<2x32xf32>
    %195 = arith.mulf %190, %192 : vector<2x32xf32>
    %196 = arith.addf %194, %195 : vector<2x32xf32>
    %197 = math.tanh %196 : vector<2x32xf32>
    %198 = arith.mulf %193, %197 : vector<2x32xf32>
    %c10 = arith.constant 10 : index
    %c0_47 = arith.constant 0 : index
    %199 = vector.load %arg12[%c10, %c0_47] : memref<16x128xf32, #tpu.memory_space<vmem>>, vector<2x128xf32>
    %cst_48 = arith.constant dense<0.000000e+00> : vector<2x128xf32>
    %200 = tpu.matmul %179, %7, %cst_48 {dimension_numbers = #tpu.dot_dimension_numbers<[1], [0], [0], [1], [0, 0, 1, 1], [], []>} : vector<2x32xf32>, vector<32x128xf32>, vector<2x128xf32> -> vector<2x128xf32>
    %201 = arith.addf %199, %200 : vector<2x128xf32>
    %202 = arith.negf %201 : vector<2x128xf32>
    %203 = math.exp %202 : vector<2x128xf32>
    %cst_49 = arith.constant 1.000000e+00 : f32
    %204 = vector.broadcast %cst_49 : f32 to vector<2x128xf32>
    %205 = arith.addf %204, %203 : vector<2x128xf32>
    %206 = arith.divf %204, %205 : vector<2x128xf32>
    %207 = math.tanh %201 : vector<2x128xf32>
    %208 = vector.extract_strided_slice %206 {offsets = [0, 0], sizes = [2, 32], strides = [1, 1]} : vector<2x128xf32> to vector<2x32xf32>
    %209 = vector.extract_strided_slice %206 {offsets = [0, 32], sizes = [2, 32], strides = [1, 1]} : vector<2x128xf32> to vector<2x32xf32>
    %210 = vector.extract_strided_slice %207 {offsets = [0, 64], sizes = [2, 32], strides = [1, 1]} : vector<2x128xf32> to vector<2x32xf32>
    %211 = vector.extract_strided_slice %206 {offsets = [0, 96], sizes = [2, 32], strides = [1, 1]} : vector<2x128xf32> to vector<2x32xf32>
    %212 = arith.mulf %209, %177 : vector<2x32xf32>
    %213 = arith.mulf %208, %210 : vector<2x32xf32>
    %214 = arith.addf %212, %213 : vector<2x32xf32>
    %215 = math.tanh %214 : vector<2x32xf32>
    %216 = arith.mulf %211, %215 : vector<2x32xf32>
    %cst_50 = arith.constant dense<0.000000e+00> : vector<2x128xf32>
    %217 = tpu.matmul %216, %8, %cst_50 {dimension_numbers = #tpu.dot_dimension_numbers<[1], [0], [0], [1], [0, 0, 1, 1], [], []>} : vector<2x32xf32>, vector<32x128xf32>, vector<2x128xf32> -> vector<2x128xf32>
    %cst_51 = arith.constant dense<0.000000e+00> : vector<2x128xf32>
    %218 = tpu.matmul %198, %9, %cst_51 {dimension_numbers = #tpu.dot_dimension_numbers<[1], [0], [0], [1], [0, 0, 1, 1], [], []>} : vector<2x32xf32>, vector<32x128xf32>, vector<2x128xf32> -> vector<2x128xf32>
    %219 = arith.addf %217, %218 : vector<2x128xf32>
    %220 = arith.addf %219, %12 : vector<2x128xf32>
    %221 = arith.negf %220 : vector<2x128xf32>
    %222 = math.exp %221 : vector<2x128xf32>
    %cst_52 = arith.constant 1.000000e+00 : f32
    %223 = vector.broadcast %cst_52 : f32 to vector<2x128xf32>
    %224 = arith.addf %223, %222 : vector<2x128xf32>
    %225 = arith.divf %223, %224 : vector<2x128xf32>
    %226 = math.tanh %220 : vector<2x128xf32>
    %227 = vector.extract_strided_slice %225 {offsets = [0, 0], sizes = [2, 32], strides = [1, 1]} : vector<2x128xf32> to vector<2x32xf32>
    %228 = vector.extract_strided_slice %225 {offsets = [0, 32], sizes = [2, 32], strides = [1, 1]} : vector<2x128xf32> to vector<2x32xf32>
    %229 = vector.extract_strided_slice %226 {offsets = [0, 64], sizes = [2, 32], strides = [1, 1]} : vector<2x128xf32> to vector<2x32xf32>
    %230 = vector.extract_strided_slice %225 {offsets = [0, 96], sizes = [2, 32], strides = [1, 1]} : vector<2x128xf32> to vector<2x32xf32>
    %231 = arith.mulf %228, %196 : vector<2x32xf32>
    %232 = arith.mulf %227, %229 : vector<2x32xf32>
    %233 = arith.addf %231, %232 : vector<2x32xf32>
    %234 = math.tanh %233 : vector<2x32xf32>
    %235 = arith.mulf %230, %234 : vector<2x32xf32>
    %c12 = arith.constant 12 : index
    %c0_53 = arith.constant 0 : index
    %236 = vector.load %arg12[%c12, %c0_53] : memref<16x128xf32, #tpu.memory_space<vmem>>, vector<2x128xf32>
    %cst_54 = arith.constant dense<0.000000e+00> : vector<2x128xf32>
    %237 = tpu.matmul %216, %7, %cst_54 {dimension_numbers = #tpu.dot_dimension_numbers<[1], [0], [0], [1], [0, 0, 1, 1], [], []>} : vector<2x32xf32>, vector<32x128xf32>, vector<2x128xf32> -> vector<2x128xf32>
    %238 = arith.addf %236, %237 : vector<2x128xf32>
    %239 = arith.negf %238 : vector<2x128xf32>
    %240 = math.exp %239 : vector<2x128xf32>
    %cst_55 = arith.constant 1.000000e+00 : f32
    %241 = vector.broadcast %cst_55 : f32 to vector<2x128xf32>
    %242 = arith.addf %241, %240 : vector<2x128xf32>
    %243 = arith.divf %241, %242 : vector<2x128xf32>
    %244 = math.tanh %238 : vector<2x128xf32>
    %245 = vector.extract_strided_slice %243 {offsets = [0, 0], sizes = [2, 32], strides = [1, 1]} : vector<2x128xf32> to vector<2x32xf32>
    %246 = vector.extract_strided_slice %243 {offsets = [0, 32], sizes = [2, 32], strides = [1, 1]} : vector<2x128xf32> to vector<2x32xf32>
    %247 = vector.extract_strided_slice %244 {offsets = [0, 64], sizes = [2, 32], strides = [1, 1]} : vector<2x128xf32> to vector<2x32xf32>
    %248 = vector.extract_strided_slice %243 {offsets = [0, 96], sizes = [2, 32], strides = [1, 1]} : vector<2x128xf32> to vector<2x32xf32>
    %249 = arith.mulf %246, %214 : vector<2x32xf32>
    %250 = arith.mulf %245, %247 : vector<2x32xf32>
    %251 = arith.addf %249, %250 : vector<2x32xf32>
    %252 = math.tanh %251 : vector<2x32xf32>
    %253 = arith.mulf %248, %252 : vector<2x32xf32>
    %cst_56 = arith.constant dense<0.000000e+00> : vector<2x128xf32>
    %254 = tpu.matmul %253, %8, %cst_56 {dimension_numbers = #tpu.dot_dimension_numbers<[1], [0], [0], [1], [0, 0, 1, 1], [], []>} : vector<2x32xf32>, vector<32x128xf32>, vector<2x128xf32> -> vector<2x128xf32>
    %cst_57 = arith.constant dense<0.000000e+00> : vector<2x128xf32>
    %255 = tpu.matmul %235, %9, %cst_57 {dimension_numbers = #tpu.dot_dimension_numbers<[1], [0], [0], [1], [0, 0, 1, 1], [], []>} : vector<2x32xf32>, vector<32x128xf32>, vector<2x128xf32> -> vector<2x128xf32>
    %256 = arith.addf %254, %255 : vector<2x128xf32>
    %257 = arith.addf %256, %12 : vector<2x128xf32>
    %258 = arith.negf %257 : vector<2x128xf32>
    %259 = math.exp %258 : vector<2x128xf32>
    %cst_58 = arith.constant 1.000000e+00 : f32
    %260 = vector.broadcast %cst_58 : f32 to vector<2x128xf32>
    %261 = arith.addf %260, %259 : vector<2x128xf32>
    %262 = arith.divf %260, %261 : vector<2x128xf32>
    %263 = math.tanh %257 : vector<2x128xf32>
    %264 = vector.extract_strided_slice %262 {offsets = [0, 0], sizes = [2, 32], strides = [1, 1]} : vector<2x128xf32> to vector<2x32xf32>
    %265 = vector.extract_strided_slice %262 {offsets = [0, 32], sizes = [2, 32], strides = [1, 1]} : vector<2x128xf32> to vector<2x32xf32>
    %266 = vector.extract_strided_slice %263 {offsets = [0, 64], sizes = [2, 32], strides = [1, 1]} : vector<2x128xf32> to vector<2x32xf32>
    %267 = vector.extract_strided_slice %262 {offsets = [0, 96], sizes = [2, 32], strides = [1, 1]} : vector<2x128xf32> to vector<2x32xf32>
    %268 = arith.mulf %265, %233 : vector<2x32xf32>
    %269 = arith.mulf %264, %266 : vector<2x32xf32>
    %270 = arith.addf %268, %269 : vector<2x32xf32>
    %271 = math.tanh %270 : vector<2x32xf32>
    %272 = arith.mulf %267, %271 : vector<2x32xf32>
    %c14 = arith.constant 14 : index
    %c0_59 = arith.constant 0 : index
    %273 = vector.load %arg12[%c14, %c0_59] : memref<16x128xf32, #tpu.memory_space<vmem>>, vector<2x128xf32>
    %cst_60 = arith.constant dense<0.000000e+00> : vector<2x128xf32>
    %274 = tpu.matmul %253, %7, %cst_60 {dimension_numbers = #tpu.dot_dimension_numbers<[1], [0], [0], [1], [0, 0, 1, 1], [], []>} : vector<2x32xf32>, vector<32x128xf32>, vector<2x128xf32> -> vector<2x128xf32>
    %275 = arith.addf %273, %274 : vector<2x128xf32>
    %276 = arith.negf %275 : vector<2x128xf32>
    %277 = math.exp %276 : vector<2x128xf32>
    %cst_61 = arith.constant 1.000000e+00 : f32
    %278 = vector.broadcast %cst_61 : f32 to vector<2x128xf32>
    %279 = arith.addf %278, %277 : vector<2x128xf32>
    %280 = arith.divf %278, %279 : vector<2x128xf32>
    %281 = math.tanh %275 : vector<2x128xf32>
    %282 = vector.extract_strided_slice %280 {offsets = [0, 0], sizes = [2, 32], strides = [1, 1]} : vector<2x128xf32> to vector<2x32xf32>
    %283 = vector.extract_strided_slice %280 {offsets = [0, 32], sizes = [2, 32], strides = [1, 1]} : vector<2x128xf32> to vector<2x32xf32>
    %284 = vector.extract_strided_slice %281 {offsets = [0, 64], sizes = [2, 32], strides = [1, 1]} : vector<2x128xf32> to vector<2x32xf32>
    %285 = vector.extract_strided_slice %280 {offsets = [0, 96], sizes = [2, 32], strides = [1, 1]} : vector<2x128xf32> to vector<2x32xf32>
    %286 = arith.mulf %283, %251 : vector<2x32xf32>
    %287 = arith.mulf %282, %284 : vector<2x32xf32>
    %288 = arith.addf %286, %287 : vector<2x32xf32>
    %289 = math.tanh %288 : vector<2x32xf32>
    %290 = arith.mulf %285, %289 : vector<2x32xf32>
    %cst_62 = arith.constant dense<0.000000e+00> : vector<2x128xf32>
    %291 = tpu.matmul %290, %8, %cst_62 {dimension_numbers = #tpu.dot_dimension_numbers<[1], [0], [0], [1], [0, 0, 1, 1], [], []>} : vector<2x32xf32>, vector<32x128xf32>, vector<2x128xf32> -> vector<2x128xf32>
    %cst_63 = arith.constant dense<0.000000e+00> : vector<2x128xf32>
    %292 = tpu.matmul %272, %9, %cst_63 {dimension_numbers = #tpu.dot_dimension_numbers<[1], [0], [0], [1], [0, 0, 1, 1], [], []>} : vector<2x32xf32>, vector<32x128xf32>, vector<2x128xf32> -> vector<2x128xf32>
    %293 = arith.addf %291, %292 : vector<2x128xf32>
    %294 = arith.addf %293, %12 : vector<2x128xf32>
    %295 = arith.negf %294 : vector<2x128xf32>
    %296 = math.exp %295 : vector<2x128xf32>
    %cst_64 = arith.constant 1.000000e+00 : f32
    %297 = vector.broadcast %cst_64 : f32 to vector<2x128xf32>
    %298 = arith.addf %297, %296 : vector<2x128xf32>
    %299 = arith.divf %297, %298 : vector<2x128xf32>
    %300 = math.tanh %294 : vector<2x128xf32>
    %301 = vector.extract_strided_slice %299 {offsets = [0, 0], sizes = [2, 32], strides = [1, 1]} : vector<2x128xf32> to vector<2x32xf32>
    %302 = vector.extract_strided_slice %299 {offsets = [0, 32], sizes = [2, 32], strides = [1, 1]} : vector<2x128xf32> to vector<2x32xf32>
    %303 = vector.extract_strided_slice %300 {offsets = [0, 64], sizes = [2, 32], strides = [1, 1]} : vector<2x128xf32> to vector<2x32xf32>
    %304 = vector.extract_strided_slice %299 {offsets = [0, 96], sizes = [2, 32], strides = [1, 1]} : vector<2x128xf32> to vector<2x32xf32>
    %305 = arith.mulf %302, %270 : vector<2x32xf32>
    %306 = arith.mulf %301, %303 : vector<2x32xf32>
    %307 = arith.addf %305, %306 : vector<2x32xf32>
    %308 = math.tanh %307 : vector<2x32xf32>
    %309 = arith.mulf %304, %308 : vector<2x32xf32>
    %c0_65 = arith.constant 0 : index
    %c0_66 = arith.constant 0 : index
    %310 = vector.load %arg7[%c0_65, %c0_66] : memref<32x128xf32, #tpu.memory_space<vmem>>, vector<32x128xf32>
    %cst_67 = arith.constant dense<0.000000e+00> : vector<2x128xf32>
    %311 = tpu.matmul %309, %310, %cst_67 {dimension_numbers = #tpu.dot_dimension_numbers<[1], [0], [0], [1], [0, 0, 1, 1], [], []>} : vector<2x32xf32>, vector<32x128xf32>, vector<2x128xf32> -> vector<2x128xf32>
    %c0_68 = arith.constant 0 : index
    %c0_69 = arith.constant 0 : index
    %312 = vector.load %arg8[%c0_68, %c0_69] : memref<1x128xf32, #tpu.memory_space<vmem>>, vector<1x128xf32>
    %313 = vector.broadcast %312 : vector<1x128xf32> to vector<2x128xf32>
    %314 = arith.addf %311, %313 : vector<2x128xf32>
    %cst_70 = arith.constant 0.000000e+00 : f32
    %315 = vector.broadcast %cst_70 : f32 to vector<2x128xf32>
    %316 = arith.maximumf %314, %315 : vector<2x128xf32>
    %c0_71 = arith.constant 0 : index
    %c0_72 = arith.constant 0 : index
    %317 = vector.load %arg9[%c0_71, %c0_72] : memref<128x128xf32, #tpu.memory_space<vmem>>, vector<128x128xf32>
    %cst_73 = arith.constant dense<0.000000e+00> : vector<2x128xf32>
    %318 = tpu.matmul %316, %317, %cst_73 {dimension_numbers = #tpu.dot_dimension_numbers<[1], [0], [0], [1], [0, 0, 1, 1], [], []>} : vector<2x128xf32>, vector<128x128xf32>, vector<2x128xf32> -> vector<2x128xf32>
    %c0_74 = arith.constant 0 : index
    %c0_75 = arith.constant 0 : index
    %319 = vector.load %arg10[%c0_74, %c0_75] : memref<1x128xf32, #tpu.memory_space<vmem>>, vector<1x128xf32>
    %320 = vector.broadcast %319 : vector<1x128xf32> to vector<2x128xf32>
    %321 = arith.addf %318, %320 : vector<2x128xf32>
    %c0_76 = arith.constant 0 : index
    %c0_77 = arith.constant 0 : index
    %322 = vector.load %arg11[%c0_76, %c0_77] : memref<2x128xf32, #tpu.memory_space<vmem>>, vector<2x128xf32>
    tpu.vector_store %arg11[%c0_76, %c0_77], %321 {strides = array<i32>} : memref<2x128xf32, #tpu.memory_space<vmem>>, vector<2x128xf32>,
    return
  }
}

</mosaic_0001>

<bundles_post_ra>
// kernel: tpu_custom_call.1
= control target key start
LH: loop header
LB: loop body
LE: loop exit
PB: predicated region body
PF: predicated region fallthrough
CT: control target
= control target key end

     0   :  { %16 = vsyncpa [#allocation4], 0  ;;  %s2175_s0 = inlined_call_operand.vmem [shape: f32[16,4], index: 0, kind: input, shape index: {}]   ;;  %s2176_s1 = inlined_call_operand.vmem [shape: f32[4,128], index: 1, kind: input, shape index: {}]   ;;  %s2177_s2 = inlined_call_operand.hbm [shape: f32[32,128], index: 2, kind: input, shape index: {}]   ;;  %s2178_s3 = inlined_call_operand.vmem [shape: f32[1,128], index: 3, kind: input, shape index: {}]   ;;  %s2179_s4 = inlined_call_operand.hbm [shape: f32[32,128], index: 4, kind: input, shape index: {}]   ;;  %s2180_s5 = inlined_call_operand.hbm [shape: f32[32,128], index: 5, kind: input, shape index: {}]   ;;  %s2181_s6 = inlined_call_operand.vmem [shape: f32[1,128], index: 6, kind: input, shape index: {}]   ;;  %s2182_s7 = inlined_call_operand.hbm [shape: f32[32,128], index: 7, kind: input, shape index: {}]   ;;  %s2183_s8 = inlined_call_operand.vmem [shape: f32[1,128], index: 8, kind: input, shape index: {}]   ;;  %s2184_s9 = inlined_call_operand.hbm [shape: f32[128,128], index: 9, kind: input, shape index: {}]   ;;  %s2185_s10 = inlined_call_operand.vmem [shape: f32[1,128], index: 10, kind: input, shape index: {}]   ;;  %s2186_s11 = inlined_call_operand.hbm [shape: f32[2,128], index: 11, kind: output, shape index: {}]  }
   0x1   :  { %17 = vsyncpa [#allocation7], 0 }
   0x2   :  { %18 = vsyncpa [#allocation10], 0 }
   0x3   :  { %19 = vsyncpa [#allocation5], 0  ;;  %s43_s19 = sshll.u32 %s2179_s4, 4  ;;  %s1783_s20 = smov [#allocation6]   ;;  %s44_s19 = int_to_ptr.hbm [resolvable:$true] %s43_s19 }
   0x4   :  { %s45_s21 = sshll.u32 %s1783_s20, 4  ;;  %s71_s24 = sshll.u32 %s2182_s7, 4  ;;  %s46_s21 = int_to_ptr.vmem [resolvable:$true] %s45_s21  ;;  %s72_s24 = int_to_ptr.hbm [resolvable:$true] %s71_s24 }
   0x5   :  { %s1784_s25 = smov 128   ;;  %s1785_s26 = smov 8  }
   0x6   :  { %51 = dma.hbm_to_vmem [thread:$0]  %s44_s19, 512, %s46_s21, [#allocation7], %s1784_s25, %s1784_s25, %s1785_s26  }
   0x7   :  { %s1786_s27 = smov [#allocation9]   ;;  %s28_s12 = sshll.u32 %s2177_s2, 4  ;;  %s29_s12 = int_to_ptr.hbm [resolvable:$true] %s28_s12 }
   0x8   :  { %s73_s28 = sshll.u32 %s1786_s27, 4  ;;  %s56_s14 = sshll.u32 %s2180_s5, 4  ;;  %s74_s28 = int_to_ptr.vmem [resolvable:$true] %s73_s28  ;;  %s57_s14 = int_to_ptr.hbm [resolvable:$true] %s56_s14 }
   0x9   :  { %79 = dma.hbm_to_vmem [thread:$0]  %s72_s24, 512, %s74_s28, [#allocation10], %s1784_s25, %s1784_s25, %s1785_s26  }
   0xa   :  { %s1787_s15 = smov [#allocation3]   ;;  %s1788_s7 = smov [#allocation8]  }
   0xb   :  { %s30_s16 = sshll.u32 %s1787_s15, 4  ;;  %s58_s17 = sshll.u32 %s1788_s7, 4  ;;  %s31_s16 = int_to_ptr.vmem [resolvable:$true] %s30_s16  ;;  %s59_s17 = int_to_ptr.vmem [resolvable:$true] %s58_s17 }
   0xc   :  { %36 = dma.hbm_to_vmem [thread:$0]  %s29_s12, 512, %s31_s16, [#allocation4], %s1784_s25, %s1784_s25, %s1785_s26  }
   0xd   :  { %s86_s20 = sshll.u32 %s2184_s9, 4  ;;  %s1789_s2 = smov [#allocation11]   ;;  %s87_s20 = int_to_ptr.hbm [resolvable:$true] %s86_s20 }
   0xe   :  { %64 = dma.hbm_to_vmem [thread:$0]  %s57_s14, 512, %s59_s17, [#allocation7], %s1784_s25, %s1784_s25, %s1785_s26  }
   0xf   :  { %s88_s21 = sshll.u32 %s1789_s2, 4  ;;  %s89_s21 = int_to_ptr.vmem [resolvable:$true] %s88_s21 }
  0x10   :  { %94 = dma.hbm_to_vmem [thread:$0]  %s87_s20, 2048, %s89_s21, [#allocation10], %s1784_s25, %s1784_s25, %s1785_s26  }
  0x11   :  { %1775 = dma.done.wait [#allocation4], 512  }
  0x12   :  { %1776 = vsyncadd [#allocation4], 4294966784 }
  0x13   :  { %1777 = dma.done.wait [#allocation7], 1024  }
  0x14   :  { %1778 = vsyncadd [#allocation7], 4294966272 }
  0x15   :  { %1779 = dma.done.wait [#allocation10], 2560  }
  0x16   :  { %1780 = vsyncadd [#allocation10], 4294964736  ;;  %vm131_vm0 = vcmask 1043456   ;;  %vm124_vm1 = vcmask 31744   ;;  %v119_v0 = vld [vmem:[%s2176_s1] sm:$0xf] }
  0x17   :  { %v117_v1 = vld [vmem:[%s2175_s0] sm:$0xff]  ;;  %v1875_v2 = vld [vmem:[#allocation3 + $0x18] sm:$0xff]  ;;  %1445 = vmatpush.msk.msra.mxu0 %vm131_vm0, %v119_v0  ;;  %v1881_v4 = vld [vmem:[#allocation3 + $0x8] sm:$0xff]  ;;  %v1790_v6 = vmov 0.0   ;;  %s1791_s25 = smov 64   ;;  %vm177_vm6 = vcmask 261120  }
  0x18   :  { %193 = vmatpush.msra.mxu1 %v1875_v2  ;;  %v1878_v3 = vld [vmem:[#allocation3 + $0x10] sm:$0xff]  ;;  %1446 = vmatmul.msk.f32.vlgmr.msra.gmra.mxu0 %vm124_vm1, %v117_v1  ;;  %v1885_v5 = vld [vmem:[#allocation3] sm:$0xff]  ;;  %v1909_v33 = vld [vmem:[#allocation6 + $0x18] sm:$0xff]  ;;  %s1793_s14 = smov [#allocation12]   ;;  %s1433_s17 = sshll.u32 %s2186_s11, 4  ;;  %s1434_s17 = int_to_ptr.hbm [resolvable:$true] %s1433_s17 }
  0x19   :  { %629 = vmatpush.msra.mxu3 %v1875_v2  ;;  %v1900_v7 = vld [vmem:[%s2178_s3] ss:$0 sm:$0xff]  ;;  %s1792_s3 = smov 32   ;;  %v1911_v34 = vld [vmem:[#allocation8 + $0x18] sm:$0xff]  ;;  %276 = vmatpush.msrb.mxu0 %v1909_v33  ;;  %v1922_v38 = vld [vmem:[#allocation8 + $0x8] sm:$0xff]  ;;  %s1431_s15 = sshll.u32 %s1793_s14, 4  ;;  %s1432_s15 = int_to_ptr.vmem [resolvable:$true] %s1431_s15 }
  0x1a   :  { %194 = vmatpush.msra.mxu1 %v1878_v3  ;;  %v1913_v35 = vld [vmem:[#allocation6 + $0x10] sm:$0xff]  ;;  %251 = vmatpush.msra.mxu2 %v1911_v34  ;;  %v118_v37 = vld [vmem:[%s2175_s0 + $0x8] sm:$0xff]  ;;  %v1925_v39 = vld [vmem:[#allocation6 + $0x8] sm:$0xff] }
  0x1b   :  { %630 = vmatpush.msra.mxu3 %v1878_v3  ;;  %v1917_v36 = vld [vmem:[#allocation8 + $0x10] sm:$0xff]  ;;  %277 = vmatpush.msrb.mxu0 %v1913_v35  ;;  %v1930_v40 = vld [vmem:[#allocation8] sm:$0xff] }
  0x1c   :  { %195 = vmatpush.msra.mxu1 %v1881_v4  ;;  %252 = vmatpush.msra.mxu2 %v1917_v36  ;;  %v1932_v41 = vld [vmem:[#allocation6] sm:$0xff]  ;;  %v1973_v48 = vld [vmem:[%s2181_s6] ss:$0 sm:$0xff] }
  0x1d   :  { %631 = vmatpush.msra.mxu3 %v1881_v4  ;;  %278 = vmatpush.msrb.mxu0 %v1925_v39 }
  0x1e   :  { %196 = vmatpush.msra.mxu1 %v1885_v5  ;;  %253 = vmatpush.msra.mxu2 %v1922_v38 }
  0x1f   :  { %197 = vmatmul.f32.vlgmr.msra.gmra.mxu1 %v1790_v6  ;;  %632 = vmatpush.msra.mxu3 %v1885_v5 }
  0x20   :  { %335 = vmatpush.msrb.mxu1 %v1875_v2  ;;  %1447 = vmatmul.msk.f32.gmra.mxu0 %vm124_vm1, %v118_v37 }
  0x21   :  { %839 = vmatpush.msrb.mxu3 %v1911_v34  ;;  %254 = vmatpush.msra.mxu2 %v1930_v40 }
  0x22   :  { %336 = vmatpush.msrb.mxu1 %v1878_v3  ;;  %279 = vmatpush.msrb.mxu0 %v1932_v41 }
  0x23   :  { %840 = vmatpush.msrb.mxu3 %v1917_v36  ;;  %255 = vmatmul.f32.vlgmr.msra.gmra.mxu2 %v1790_v6 }
  0x24   :  { %337 = vmatpush.msrb.mxu1 %v1881_v4  ;;  %482 = vmatpush.msra.mxu0 %v1875_v2 }
  0x25   :  { %398 = vmatpush.msrb.mxu2 %v1911_v34  ;;  %841 = vmatpush.msrb.mxu3 %v1922_v38 }
  0x26   :  { %338 = vmatpush.msrb.mxu1 %v1885_v5  ;;  %483 = vmatpush.msra.mxu0 %v1878_v3 }
  0x27   :  { %399 = vmatpush.msrb.mxu2 %v1917_v36  ;;  %842 = vmatpush.msrb.mxu3 %v1930_v40 }
  0x28   :  { %423 = vmatpush.msra.mxu1 %v1909_v33  ;;  %484 = vmatpush.msra.mxu0 %v1881_v4 }
  0x29   :  { %400 = vmatpush.msrb.mxu2 %v1922_v38 }
  0x2a   :  { %424 = vmatpush.msra.mxu1 %v1913_v35  ;;  %485 = vmatpush.msra.mxu0 %v1885_v5 }
  0x2b   :  { %401 = vmatpush.msrb.mxu2 %v1930_v40 }
  0x2c   :  { %425 = vmatpush.msra.mxu1 %v1925_v39 }
  0x2d   :  { %570 = vmatpush.msra.mxu2 %v1909_v33 }
  0x2e   :  { %426 = vmatpush.msra.mxu1 %v1932_v41 }
  0x2f   :  { %571 = vmatpush.msra.mxu2 %v1913_v35 }
  0x31   :  { %572 = vmatpush.msra.mxu2 %v1925_v39 }
  0x33   :  { %573 = vmatpush.msra.mxu2 %v1932_v41 }
  0x95   :  { %v152_v8 = vpop.f32.mrf.mxu0 }
  0x96   :  { %v153_v9 = vadd.f32 %v1900_v7, %v152_v8 }
  0x98   :  { %158 = vst [vmem:[#allocation2] sm:$0xff] %v153_v9 }
  0x9c   :  { %v198_v10 = vpop.f32.mrf.mxu1 }
  0x9d   :  { %v155_v44 = vpop.f32.mrf.mxu0 }
  0x9e   :  { %v156_v45 = vadd.f32 %v1900_v7, %v155_v44 }
  0x9f   :  { %v176_v11 = vld [vmem:[#allocation2] sm:$0x3]  ;;  %v322_v53 = vld [vmem:[#allocation2 + $0x2] sm:$0x3] }
  0xa0   :  { %v201_v12 = vadd.f32 %v198_v10, %v176_v11  ;;  %159 = vst [vmem:[#allocation2 + $0x8] sm:$0xff] %v156_v45 }
  0xa2   :  { %1502 = vtanh.f32 %v201_v12  ;;  %v1448_v14 = vmul.f32 -1.442695, %v201_v12 }
  0xa4   :  { %1504 = vpow2.f32 %v1448_v14 }
  0xa6   :  { %v256_v47 = vpop.f32.mrf.mxu2 }
  0xa8   :  { %v1503_v13 = vpop.eup %1502 }
  0xa9   :  { %224 = vrot.lane.b32.xlu0 %v1503_v13, %s1791_s25 }
  0xaa   :  { %v1505_v15 = vpop.eup %1504 }
  0xab   :  { %v205_v16 = vadd.f32 1.0, %v1505_v15 }
  0xad   :  { %1506 = vrcp.f32 %v205_v16  ;;  %v217_v22 = vand.u32 2147483648, %v205_v16  ;;  %vm211_vm3 = vweird.f32 %v205_v16  ;;  %v215_v23 = vand.u32 2147483647, %v205_v16 }
  0xaf   :  { %v218_v25 = vor.u32 1.1754944e-38, %v217_v22  ;;  %vm216_vm5 = vcmp.eq.f32.partialorder %v215_v23, 8.507059e+37 }
  0xb3   :  { %v1507_v17 = vpop.eup %1506 }
  0xb4   :  { %v207_v18 = vmul.f32 %v1507_v17, %v205_v16  ;;  %vm212_vm2 = vweird.f32 %v1507_v17 }
  0xb5   :  { %vm213_vm4 = vmor %vm211_vm3, %vm212_vm2 }
  0xb6   :  { %v208_v19 = vsub.f32 1.0, %v207_v18 }
  0xb8   :  { %v209_v20 = vmul.f32 %v1507_v17, %v208_v19 }
  0xba   :  { %v210_v21 = vadd.f32 %v1507_v17, %v209_v20 }
  0xbc   :  { %v214_v24 = vsel %vm213_vm4, %v1507_v17, %v210_v21 }
  0xbd   :  { %v219_v27 = vsel %vm216_vm5, %v218_v25, %v214_v24 }
  0xbe   :  { %v222_v29 = vmul.f32 0.0, %v219_v27 }
 0x11b   :  { %v225_v26 = vpop.permute.xlu0 %224 }
 0x11c   :  { %v227_v28 = vmul.f32 %v225_v26, %v219_v27 }
 0x11e   :  { %229 = vrot.lane.b32.xlu0 %v227_v28, %s1792_s3 }
 0x190   :  { %v230_v30 = vpop.permute.xlu0 %229 }
 0x191   :  { %v1905_v31 = vadd.f32 %v230_v30, %v222_v29 }
 0x193   :  { %1508 = vtanh.f32 %v1905_v31 }
 0x199   :  { %v1509_v32 = vpop.eup %1508 }
 0x19a   :  { %235 = vrot.lane.b32.xlu1 %v1509_v32, %s1791_s25 }
 0x20c   :  { %v236_v42 = vpop.permute.xlu1 %235 }
 0x20d   :  { %v238_v43 = vmul.f32 %v236_v42, %v219_v27 }
 0x20f   :  { %260 = vrot.lane.b32.xlu1 %v238_v43, %s1792_s3 }
 0x281   :  { %v261_v46 = vpop.permute.xlu1 %260 }
 0x282   :  { %1449 = vmatmul.msk.f32.vlgmr.msrb.gmra.mxu0 %vm177_vm6, %v261_v46  ;;  %1451 = vmatmul.msk.f32.vlgmr.msrb.gmra.mxu1 %vm177_vm6, %v261_v46 }
 0x283   :  { %545 = vmatpush.msrb.mxu1 %v1911_v34  ;;  %692 = vmatpush.msrb.mxu0 %v1911_v34 }
 0x285   :  { %546 = vmatpush.msrb.mxu1 %v1917_v36  ;;  %693 = vmatpush.msrb.mxu0 %v1917_v36 }
 0x287   :  { %547 = vmatpush.msrb.mxu1 %v1922_v38  ;;  %694 = vmatpush.msrb.mxu0 %v1922_v38 }
 0x289   :  { %548 = vmatpush.msrb.mxu1 %v1930_v40  ;;  %695 = vmatpush.msrb.mxu0 %v1930_v40 }
 0x2ff   :  { %v281_v49 = vpop.f32.mrf.mxu0  ;;  %v340_v52 = vpop.f32.mrf.mxu1 }
 0x300   :  { %v282_v50 = vadd.f32 %v281_v49, %v256_v47  ;;  %v343_v54 = vadd.f32 %v340_v52, %v322_v53  ;;  %v469_v52 = vld [vmem:[#allocation2 + $0x4] sm:$0x3] }
 0x302   :  { %v284_v51 = vadd.f32 %v1973_v48, %v282_v50  ;;  %v1452_v58 = vmul.f32 -1.442695, %v343_v54 }
 0x304   :  { %1510 = vtanh.f32 %v284_v51  ;;  %v1450_v57 = vmul.f32 -1.442695, %v284_v51 }
 0x305   :  { %1512 = vtanh.f32 %v343_v54 }
 0x306   :  { %1514 = vpow2.f32 %v1450_v57 }
 0x307   :  { %1516 = vpow2.f32 %v1452_v58 }
 0x30a   :  { %v1511_v55 = vpop.eup %1510 }
 0x30b   :  { %307 = vrot.lane.b32.xlu2 %v1511_v55, %s1791_s25  ;;  %v1513_v56 = vpop.eup %1512 }
 0x30c   :  { %v1515_v59 = vpop.eup %1514 }
 0x30d   :  { %v288_v60 = vadd.f32 1.0, %v1515_v59  ;;  %v1517_v61 = vpop.eup %1516 }
 0x30e   :  { %v347_v62 = vadd.f32 1.0, %v1517_v61 }
 0x30f   :  { %1518 = vrcp.f32 %v288_v60  ;;  %v300_v11 = vand.u32 2147483648, %v288_v60  ;;  %vm294_vm8 = vweird.f32 %v288_v60  ;;  %v298_v12 = vand.u32 2147483647, %v288_v60 }
 0x310   :  { %1520 = vrcp.f32 %v347_v62  ;;  %v359_v20 = vand.u32 2147483648, %v347_v62  ;;  %vm353_vm12 = vweird.f32 %v347_v62  ;;  %v357_v21 = vand.u32 2147483647, %v347_v62 }
 0x311   :  { %v301_v15 = vor.u32 1.1754944e-38, %v300_v11  ;;  %vm299_vm10 = vcmp.eq.f32.partialorder %v298_v12, 8.507059e+37 }
 0x312   :  { %v360_v23 = vor.u32 1.1754944e-38, %v359_v20  ;;  %vm358_vm14 = vcmp.eq.f32.partialorder %v357_v21, 8.507059e+37 }
 0x313   :  { %366 = vrot.lane.b32.xlu2 %v1513_v56, %s1791_s25 }
 0x315   :  { %v1519_v63 = vpop.eup %1518 }
 0x316   :  { %v290_v0 = vmul.f32 %v1519_v63, %v288_v60  ;;  %v1521_v6 = vpop.eup %1520  ;;  %vm295_vm7 = vweird.f32 %v1519_v63 }
 0x317   :  { %v349_v8 = vmul.f32 %v1521_v6, %v347_v62  ;;  %vm296_vm9 = vmor %vm294_vm8, %vm295_vm7  ;;  %vm354_vm11 = vweird.f32 %v1521_v6 }
 0x318   :  { %v291_v1 = vsub.f32 1.0, %v290_v0  ;;  %vm355_vm13 = vmor %vm353_vm12, %vm354_vm11 }
 0x319   :  { %v350_v10 = vsub.f32 1.0, %v349_v8 }
 0x31a   :  { %v292_v7 = vmul.f32 %v1519_v63, %v291_v1 }
 0x31b   :  { %v351_v14 = vmul.f32 %v1521_v6, %v350_v10 }
 0x31c   :  { %v293_v9 = vadd.f32 %v1519_v63, %v292_v7 }
 0x31d   :  { %v352_v19 = vadd.f32 %v1521_v6, %v351_v14 }
 0x31e   :  { %v297_v13 = vsel %vm296_vm9, %v1519_v63, %v293_v9 }
 0x31f   :  { %v302_v17 = vsel %vm299_vm10, %v301_v15, %v297_v13  ;;  %v356_v22 = vsel %vm355_vm13, %v1521_v6, %v352_v19 }
 0x320   :  { %v361_v24 = vsel %vm358_vm14, %v360_v23, %v356_v22  ;;  %v305_v27 = vmul.f32 0.0, %v302_v17 }
 0x321   :  { %v364_v30 = vmul.f32 %v361_v24, %v1905_v31 }
 0x365   :  { %v308_v16 = vpop.permute.xlu2 %307 }
 0x366   :  { %v310_v18 = vmul.f32 %v308_v16, %v302_v17 }
 0x368   :  { %312 = vrot.lane.b32.xlu0 %v310_v18, %s1792_s3 }
 0x36d   :  { %v367_v25 = vpop.permute.xlu2 %366 }
 0x36e   :  { %v369_v26 = vmul.f32 %v367_v25, %v361_v24 }
 0x370   :  { %371 = vrot.lane.b32.xlu1 %v369_v26, %s1792_s3 }
 0x3da   :  { %v313_v28 = vpop.permute.xlu0 %312 }
 0x3db   :  { %v1980_v29 = vadd.f32 %v313_v28, %v305_v27 }
 0x3dd   :  { %1522 = vtanh.f32 %v1980_v29 }
 0x3e2   :  { %v372_v32 = vpop.permute.xlu1 %371 }
 0x3e3   :  { %v1523_v37 = vpop.eup %1522  ;;  %v1984_v42 = vadd.f32 %v372_v32, %v364_v30 }
 0x3e4   :  { %318 = vrot.lane.b32.xlu2 %v1523_v37, %s1791_s25 }
 0x3e5   :  { %1524 = vtanh.f32 %v1984_v42 }
 0x3eb   :  { %v1525_v43 = vpop.eup %1524 }
 0x3ec   :  { %377 = vrot.lane.b32.xlu0 %v1525_v43, %s1791_s25 }
 0x43e   :  { %v319_v44 = vpop.permute.xlu2 %318 }
 0x43f   :  { %v321_v45 = vmul.f32 %v319_v44, %v302_v17 }
 0x441   :  { %382 = vrot.lane.b32.xlu1 %v321_v45, %s1792_s3 }
 0x45e   :  { %v378_v46 = vpop.permute.xlu0 %377 }
 0x45f   :  { %v380_v47 = vmul.f32 %v378_v46, %v361_v24 }
 0x461   :  { %407 = vrot.lane.b32.xlu2 %v380_v47, %s1792_s3 }
 0x4b3   :  { %v383_v31 = vpop.permute.xlu1 %382 }
 0x4b4   :  { %1453 = vmatmul.msk.f32.vlgmr.msrb.gmra.mxu2 %vm177_vm6, %v383_v31 }
 0x4b5   :  { %776 = vmatpush.msrb.mxu2 %v1875_v2 }
 0x4b7   :  { %777 = vmatpush.msrb.mxu2 %v1878_v3 }
 0x4b9   :  { %778 = vmatpush.msrb.mxu2 %v1881_v4 }
 0x4bb   :  { %v408_v49 = vpop.permute.xlu2 %407  ;;  %779 = vmatpush.msrb.mxu2 %v1885_v5 }
 0x4bc   :  { %1454 = vmatmul.msk.f32.vlgmr.msra.gmra.mxu1 %vm177_vm6, %v408_v49  ;;  %1456 = vmatmul.msk.f32.vlgmr.msra.gmra.mxu0 %vm177_vm6, %v408_v49 }
 0x4bd   :  { %717 = vmatpush.msra.mxu1 %v1909_v33  ;;  %864 = vmatpush.msra.mxu0 %v1909_v33 }
 0x4bf   :  { %718 = vmatpush.msra.mxu1 %v1913_v35  ;;  %865 = vmatpush.msra.mxu0 %v1913_v35 }
 0x4c1   :  { %719 = vmatpush.msra.mxu1 %v1925_v39  ;;  %866 = vmatpush.msra.mxu0 %v1925_v39 }
 0x4c3   :  { %720 = vmatpush.msra.mxu1 %v1932_v41  ;;  %867 = vmatpush.msra.mxu0 %v1932_v41 }
 0x537   :  { %v403_v50 = vpop.f32.mrf.mxu2 }
 0x539   :  { %v428_v51 = vpop.f32.mrf.mxu1  ;;  %v487_v53 = vpop.f32.mrf.mxu0 }
 0x53a   :  { %v429_v54 = vadd.f32 %v428_v51, %v403_v50  ;;  %v490_v55 = vadd.f32 %v487_v53, %v469_v52 }
 0x53c   :  { %v431_v56 = vadd.f32 %v1973_v48, %v429_v54  ;;  %1526 = vtanh.f32 %v490_v55  ;;  %v1457_v59 = vmul.f32 -1.442695, %v490_v55  ;;  %v616_v54 = vld [vmem:[#allocation2 + $0x6] sm:$0x3] }
 0x53e   :  { %1528 = vtanh.f32 %v431_v56  ;;  %v1455_v60 = vmul.f32 -1.442695, %v431_v56 }
 0x53f   :  { %1530 = vpow2.f32 %v1457_v59 }
 0x540   :  { %1532 = vpow2.f32 %v1455_v60 }
 0x542   :  { %v1527_v57 = vpop.eup %1526 }
 0x543   :  { %513 = vrot.lane.b32.xlu0 %v1527_v57, %s1791_s25 }
 0x544   :  { %v1529_v58 = vpop.eup %1528 }
 0x545   :  { %454 = vrot.lane.b32.xlu1 %v1529_v58, %s1791_s25  ;;  %v1531_v61 = vpop.eup %1530 }
 0x546   :  { %v1533_v62 = vpop.eup %1532  ;;  %v494_v63 = vadd.f32 1.0, %v1531_v61 }
 0x547   :  { %v435_v0 = vadd.f32 1.0, %v1533_v62 }
 0x548   :  { %1534 = vrcp.f32 %v494_v63  ;;  %v506_v14 = vand.u32 2147483648, %v494_v63  ;;  %vm500_vm0 = vweird.f32 %v494_v63  ;;  %v504_v15 = vand.u32 2147483647, %v494_v63 }
 0x549   :  { %1536 = vrcp.f32 %v435_v0  ;;  %v447_v17 = vand.u32 2147483648, %v435_v0  ;;  %vm441_vm3 = vweird.f32 %v435_v0  ;;  %v445_v19 = vand.u32 2147483647, %v435_v0 }
 0x54a   :  { %v507_v20 = vor.u32 1.1754944e-38, %v506_v14  ;;  %vm505_vm5 = vcmp.eq.f32.partialorder %v504_v15, 8.507059e+37 }
 0x54b   :  { %v448_v24 = vor.u32 1.1754944e-38, %v447_v17  ;;  %vm446_vm7 = vcmp.eq.f32.partialorder %v445_v19, 8.507059e+37 }
 0x54e   :  { %v1535_v1 = vpop.eup %1534 }
 0x54f   :  { %v1537_v6 = vpop.eup %1536  ;;  %v496_v7 = vmul.f32 %v1535_v1, %v494_v63  ;;  %vm501_vm15 = vweird.f32 %v1535_v1 }
 0x550   :  { %v437_v8 = vmul.f32 %v1537_v6, %v435_v0  ;;  %vm442_vm1 = vweird.f32 %v1537_v6  ;;  %vm502_vm2 = vmor %vm500_vm0, %vm501_vm15 }
 0x551   :  { %v497_v9 = vsub.f32 1.0, %v496_v7  ;;  %vm443_vm4 = vmor %vm441_vm3, %vm442_vm1 }
 0x552   :  { %v438_v10 = vsub.f32 1.0, %v437_v8 }
 0x553   :  { %v498_v11 = vmul.f32 %v1535_v1, %v497_v9 }
 0x554   :  { %v439_v12 = vmul.f32 %v1537_v6, %v438_v10 }
 0x555   :  { %v499_v13 = vadd.f32 %v1535_v1, %v498_v11 }
 0x556   :  { %v440_v16 = vadd.f32 %v1537_v6, %v439_v12 }
 0x557   :  { %v503_v18 = vsel %vm502_vm2, %v1535_v1, %v499_v13 }
 0x558   :  { %v444_v21 = vsel %vm443_vm4, %v1537_v6, %v440_v16  ;;  %v508_v23 = vsel %vm505_vm5, %v507_v20, %v503_v18 }
 0x559   :  { %v449_v27 = vsel %vm446_vm7, %v448_v24, %v444_v21  ;;  %v511_v30 = vmul.f32 %v508_v23, %v1984_v42 }
 0x55a   :  { %v452_v44 = vmul.f32 %v449_v27, %v1980_v29 }
 0x5b5   :  { %v514_v22 = vpop.permute.xlu0 %513 }
 0x5b6   :  { %v516_v25 = vmul.f32 %v514_v22, %v508_v23 }
 0x5b7   :  { %v455_v26 = vpop.permute.xlu1 %454 }
 0x5b8   :  { %v457_v28 = vmul.f32 %v455_v26, %v449_v27  ;;  %518 = vrot.lane.b32.xlu2 %v516_v25, %s1792_s3 }
 0x5ba   :  { %459 = vrot.lane.b32.xlu0 %v457_v28, %s1792_s3 }
 0x612   :  { %v519_v32 = vpop.permute.xlu2 %518 }
 0x613   :  { %v2012_v37 = vadd.f32 %v519_v32, %v511_v30 }
 0x615   :  { %1538 = vtanh.f32 %v2012_v37 }
 0x61b   :  { %v1539_v43 = vpop.eup %1538 }
 0x61c   :  { %524 = vrot.lane.b32.xlu1 %v1539_v43, %s1791_s25 }
 0x62c   :  { %v460_v45 = vpop.permute.xlu0 %459 }
 0x62d   :  { %v2017_v46 = vadd.f32 %v460_v45, %v452_v44 }
 0x62f   :  { %1540 = vtanh.f32 %v2017_v46 }
 0x635   :  { %v1541_v47 = vpop.eup %1540 }
 0x636   :  { %465 = vrot.lane.b32.xlu2 %v1541_v47, %s1791_s25 }
 0x68e   :  { %v525_v31 = vpop.permute.xlu1 %524 }
 0x68f   :  { %v527_v42 = vmul.f32 %v525_v31, %v508_v23 }
 0x690   :  { %v466_v49 = vpop.permute.xlu2 %465 }
 0x691   :  { %v468_v50 = vmul.f32 %v466_v49, %v449_v27  ;;  %554 = vrot.lane.b32.xlu0 %v527_v42, %s1792_s3 }
 0x693   :  { %529 = vrot.lane.b32.xlu1 %v468_v50, %s1792_s3 }
 0x703   :  { %v555_v51 = vpop.permute.xlu0 %554 }
 0x704   :  { %1459 = vmatmul.msk.f32.vlgmr.msra.gmra.mxu2 %vm177_vm6, %v555_v51  ;;  %1461 = vmatmul.msk.f32.vlgmr.msra.gmra.mxu3 %vm177_vm6, %v555_v51 }
 0x705   :  { %v530_v29 = vpop.permute.xlu1 %529  ;;  %1011 = vmatpush.msra.mxu3 %v1909_v33  ;;  %986 = vmatpush.msra.mxu2 %v1911_v34 }
 0x706   :  { %1458 = vmatmul.msk.f32.vlgmr.msrb.gmra.mxu1 %vm177_vm6, %v530_v29 }
 0x707   :  { %923 = vmatpush.msrb.mxu1 %v1875_v2  ;;  %1012 = vmatpush.msra.mxu3 %v1913_v35 }
 0x708   :  { %987 = vmatpush.msra.mxu2 %v1917_v36 }
 0x709   :  { %924 = vmatpush.msrb.mxu1 %v1878_v3  ;;  %1013 = vmatpush.msra.mxu3 %v1925_v39 }
 0x70a   :  { %988 = vmatpush.msra.mxu2 %v1922_v38 }
 0x70b   :  { %925 = vmatpush.msrb.mxu1 %v1881_v4  ;;  %1014 = vmatpush.msra.mxu3 %v1932_v41 }
 0x70c   :  { %989 = vmatpush.msra.mxu2 %v1930_v40 }
 0x70d   :  { %926 = vmatpush.msrb.mxu1 %v1885_v5 }
 0x783   :  { %v550_v52 = vpop.f32.mrf.mxu1 }
 0x787   :  { %v575_v53 = vpop.f32.mrf.mxu2  ;;  %v634_v55 = vpop.f32.mrf.mxu3 }
 0x788   :  { %v576_v56 = vadd.f32 %v575_v53, %v550_v52  ;;  %v637_v57 = vadd.f32 %v634_v55, %v616_v54 }
 0x78a   :  { %v578_v58 = vadd.f32 %v1973_v48, %v576_v56  ;;  %1542 = vtanh.f32 %v637_v57  ;;  %v1462_v0 = vmul.f32 -1.442695, %v637_v57 }
 0x78c   :  { %1544 = vtanh.f32 %v578_v58  ;;  %v1460_v61 = vmul.f32 -1.442695, %v578_v58  ;;  %v763_v58 = vld [vmem:[#allocation2 + $0x8] sm:$0x3] }
 0x78e   :  { %1546 = vpow2.f32 %v1460_v61 }
 0x790   :  { %v1543_v59 = vpop.eup %1542 }
 0x791   :  { %660 = vrot.lane.b32.xlu0 %v1543_v59, %s1791_s25 }
 0x792   :  { %v1545_v60 = vpop.eup %1544 }
 0x793   :  { %601 = vrot.lane.b32.xlu2 %v1545_v60, %s1791_s25 }
 0x794   :  { %v1547_v62 = vpop.eup %1546 }
 0x795   :  { %v582_v63 = vadd.f32 1.0, %v1547_v62 }
 0x797   :  { %1548 = vrcp.f32 %v582_v63  ;;  %v594_v12 = vand.u32 2147483648, %v582_v63  ;;  %vm588_vm9 = vweird.f32 %v582_v63  ;;  %v592_v13 = vand.u32 2147483647, %v582_v63 }
 0x798   :  { %1550 = vpow2.f32 %v1462_v0 }
 0x799   :  { %v595_v15 = vor.u32 1.1754944e-38, %v594_v12  ;;  %vm593_vm11 = vcmp.eq.f32.partialorder %v592_v13, 8.507059e+37 }
 0x79d   :  { %v1549_v1 = vpop.eup %1548 }
 0x79e   :  { %v584_v6 = vmul.f32 %v1549_v1, %v582_v63  ;;  %v1551_v8 = vpop.eup %1550  ;;  %vm589_vm8 = vweird.f32 %v1549_v1 }
 0x79f   :  { %v641_v10 = vadd.f32 1.0, %v1551_v8  ;;  %vm590_vm10 = vmor %vm588_vm9, %vm589_vm8 }
 0x7a0   :  { %v585_v7 = vsub.f32 1.0, %v584_v6 }
 0x7a1   :  { %1552 = vrcp.f32 %v641_v10  ;;  %v653_v24 = vand.u32 2147483648, %v641_v10  ;;  %vm647_vm13 = vweird.f32 %v641_v10  ;;  %v651_v25 = vand.u32 2147483647, %v641_v10 }
 0x7a2   :  { %v586_v9 = vmul.f32 %v1549_v1, %v585_v7 }
 0x7a3   :  { %v654_v27 = vor.u32 1.1754944e-38, %v653_v24  ;;  %vm652_vm15 = vcmp.eq.f32.partialorder %v651_v25, 8.507059e+37 }
 0x7a4   :  { %v587_v11 = vadd.f32 %v1549_v1, %v586_v9 }
 0x7a6   :  { %v591_v14 = vsel %vm590_vm10, %v1549_v1, %v587_v11 }
 0x7a7   :  { %v1553_v16 = vpop.eup %1552  ;;  %v596_v18 = vsel %vm593_vm11, %v595_v15, %v591_v14 }
 0x7a8   :  { %v643_v20 = vmul.f32 %v1553_v16, %v641_v10  ;;  %vm648_vm12 = vweird.f32 %v1553_v16  ;;  %v599_v47 = vmul.f32 %v596_v18, %v2017_v46 }
 0x7a9   :  { %vm649_vm14 = vmor %vm647_vm13, %vm648_vm12 }
 0x7aa   :  { %v644_v21 = vsub.f32 1.0, %v643_v20 }
 0x7ac   :  { %v645_v22 = vmul.f32 %v1553_v16, %v644_v21 }
 0x7ae   :  { %v646_v23 = vadd.f32 %v1553_v16, %v645_v22 }
 0x7b0   :  { %v650_v26 = vsel %vm649_vm14, %v1553_v16, %v646_v23 }
 0x7b1   :  { %v655_v30 = vsel %vm652_vm15, %v654_v27, %v650_v26 }
 0x7b2   :  { %v658_v43 = vmul.f32 %v655_v30, %v2012_v37 }
 0x7ed   :  { %v602_v17 = vpop.permute.xlu2 %601 }
 0x7ee   :  { %v604_v19 = vmul.f32 %v602_v17, %v596_v18 }
 0x7f0   :  { %606 = vrot.lane.b32.xlu1 %v604_v19, %s1792_s3 }
 0x803   :  { %v661_v28 = vpop.permute.xlu0 %660 }
 0x804   :  { %v663_v32 = vmul.f32 %v661_v28, %v655_v30 }
 0x806   :  { %665 = vrot.lane.b32.xlu2 %v663_v32, %s1792_s3 }
 0x860   :  { %v666_v44 = vpop.permute.xlu2 %665 }
 0x861   :  { %v2044_v45 = vadd.f32 %v666_v44, %v658_v43 }
 0x862   :  { %v607_v31 = vpop.permute.xlu1 %606 }
 0x863   :  { %1554 = vtanh.f32 %v2044_v45  ;;  %v2048_v42 = vadd.f32 %v607_v31, %v599_v47 }
 0x865   :  { %1556 = vtanh.f32 %v2048_v42 }
 0x869   :  { %v1555_v49 = vpop.eup %1554 }
 0x86a   :  { %671 = vrot.lane.b32.xlu1 %v1555_v49, %s1791_s25 }
 0x86b   :  { %v1557_v50 = vpop.eup %1556 }
 0x86c   :  { %612 = vrot.lane.b32.xlu0 %v1557_v50, %s1791_s25 }
 0x8dc   :  { %v672_v51 = vpop.permute.xlu1 %671 }
 0x8dd   :  { %v674_v37 = vmul.f32 %v672_v51, %v655_v30 }
 0x8de   :  { %v613_v29 = vpop.permute.xlu0 %612 }
 0x8df   :  { %v615_v52 = vmul.f32 %v613_v29, %v596_v18  ;;  %701 = vrot.lane.b32.xlu0 %v674_v37, %s1792_s3 }
 0x8e1   :  { %676 = vrot.lane.b32.xlu2 %v615_v52, %s1792_s3 }
 0x93b   :  { %v677_v46 = vpop.permute.xlu2 %676 }
 0x93c   :  { %1463 = vmatmul.msk.f32.vlgmr.msrb.gmra.mxu0 %vm177_vm6, %v677_v46 }
 0x93d   :  { %1070 = vmatpush.msrb.mxu0 %v1875_v2 }
 0x93f   :  { %1071 = vmatpush.msrb.mxu0 %v1878_v3 }
 0x941   :  { %1072 = vmatpush.msrb.mxu0 %v1881_v4 }
 0x943   :  { %1073 = vmatpush.msrb.mxu0 %v1885_v5 }
 0x951   :  { %v702_v53 = vpop.permute.xlu0 %701 }
 0x952   :  { %1464 = vmatmul.msk.f32.vlgmr.msra.gmra.mxu1 %vm177_vm6, %v702_v53  ;;  %1466 = vmatmul.msk.f32.vlgmr.msrb.gmra.mxu2 %vm177_vm6, %v702_v53 }
 0x953   :  { %1158 = vmatpush.msrb.mxu2 %v1909_v33  ;;  %1133 = vmatpush.msra.mxu1 %v1911_v34 }
 0x955   :  { %1159 = vmatpush.msrb.mxu2 %v1913_v35  ;;  %1134 = vmatpush.msra.mxu1 %v1917_v36 }
 0x957   :  { %1160 = vmatpush.msrb.mxu2 %v1925_v39  ;;  %1135 = vmatpush.msra.mxu1 %v1922_v38 }
 0x959   :  { %1161 = vmatpush.msrb.mxu2 %v1932_v41  ;;  %1136 = vmatpush.msra.mxu1 %v1930_v40 }
 0x9b9   :  { %v697_v54 = vpop.f32.mrf.mxu0 }
 0x9cf   :  { %v722_v55 = vpop.f32.mrf.mxu1 }
 0x9d0   :  { %v723_v56 = vadd.f32 %v722_v55, %v697_v54 }
 0x9d2   :  { %v725_v57 = vadd.f32 %v1973_v48, %v723_v56 }
 0x9d4   :  { %1558 = vtanh.f32 %v725_v57  ;;  %v1465_v6 = vmul.f32 -1.442695, %v725_v57 }
 0x9d5   :  { %v781_v59 = vpop.f32.mrf.mxu2 }
 0x9d6   :  { %v784_v60 = vadd.f32 %v781_v59, %v763_v58 }
 0x9d8   :  { %1560 = vtanh.f32 %v784_v60  ;;  %v1467_v63 = vmul.f32 -1.442695, %v784_v60 }
 0x9da   :  { %v1559_v61 = vpop.eup %1558  ;;  %1562 = vpow2.f32 %v1467_v63 }
 0x9db   :  { %748 = vrot.lane.b32.xlu1 %v1559_v61, %s1791_s25 }
 0x9de   :  { %v1561_v62 = vpop.eup %1560 }
 0x9df   :  { %807 = vrot.lane.b32.xlu2 %v1561_v62, %s1791_s25 }
 0x9e0   :  { %v1563_v0 = vpop.eup %1562 }
 0x9e1   :  { %v788_v1 = vadd.f32 1.0, %v1563_v0 }
 0x9e3   :  { %1564 = vrcp.f32 %v788_v1  ;;  %v800_v14 = vand.u32 2147483648, %v788_v1  ;;  %vm794_vm1 = vweird.f32 %v788_v1  ;;  %v798_v15 = vand.u32 2147483647, %v788_v1 }
 0x9e4   :  { %1566 = vpow2.f32 %v1465_v6 }
 0x9e5   :  { %v801_v18 = vor.u32 1.1754944e-38, %v800_v14  ;;  %vm799_vm3 = vcmp.eq.f32.partialorder %v798_v15, 8.507059e+37 }
 0x9e9   :  { %v1565_v7 = vpop.eup %1564 }
 0x9ea   :  { %v790_v8 = vmul.f32 %v1565_v7, %v788_v1  ;;  %v1567_v9 = vpop.eup %1566  ;;  %vm795_vm0 = vweird.f32 %v1565_v7 }
 0x9eb   :  { %v729_v11 = vadd.f32 1.0, %v1567_v9  ;;  %vm796_vm2 = vmor %vm794_vm1, %vm795_vm0 }
 0x9ec   :  { %v791_v10 = vsub.f32 1.0, %v790_v8 }
 0x9ed   :  { %1568 = vrcp.f32 %v729_v11  ;;  %v741_v26 = vand.u32 2147483648, %v729_v11  ;;  %vm735_vm5 = vweird.f32 %v729_v11  ;;  %v739_v27 = vand.u32 2147483647, %v729_v11 }
 0x9ee   :  { %v792_v12 = vmul.f32 %v1565_v7, %v791_v10 }
 0x9ef   :  { %v742_v30 = vor.u32 1.1754944e-38, %v741_v26  ;;  %vm740_vm8 = vcmp.eq.f32.partialorder %v739_v27, 8.507059e+37 }
 0x9f0   :  { %v793_v13 = vadd.f32 %v1565_v7, %v792_v12 }
 0x9f2   :  { %v797_v16 = vsel %vm796_vm2, %v1565_v7, %v793_v13 }
 0x9f3   :  { %v1569_v17 = vpop.eup %1568  ;;  %v802_v20 = vsel %vm799_vm3, %v801_v18, %v797_v16 }
 0x9f4   :  { %v731_v22 = vmul.f32 %v1569_v17, %v729_v11  ;;  %vm736_vm4 = vweird.f32 %v1569_v17  ;;  %v805_v47 = vmul.f32 %v802_v20, %v2044_v45 }
 0x9f5   :  { %vm737_vm7 = vmor %vm735_vm5, %vm736_vm4 }
 0x9f6   :  { %v732_v23 = vsub.f32 1.0, %v731_v22 }
 0x9f8   :  { %v733_v24 = vmul.f32 %v1569_v17, %v732_v23 }
 0x9fa   :  { %v734_v25 = vadd.f32 %v1569_v17, %v733_v24 }
 0x9fc   :  { %v738_v28 = vsel %vm737_vm7, %v1569_v17, %v734_v25 }
 0x9fd   :  { %v743_v43 = vsel %vm740_vm8, %v742_v30, %v738_v28 }
 0x9fe   :  { %v746_v51 = vmul.f32 %v743_v43, %v2048_v42 }
 0xa39   :  { %v808_v19 = vpop.permute.xlu2 %807 }
 0xa3a   :  { %v810_v21 = vmul.f32 %v808_v19, %v802_v20 }
 0xa3c   :  { %812 = vrot.lane.b32.xlu1 %v810_v21, %s1792_s3 }
 0xa4d   :  { %v749_v32 = vpop.permute.xlu1 %748 }
 0xa4e   :  { %v751_v44 = vmul.f32 %v749_v32, %v743_v43 }
 0xa50   :  { %753 = vrot.lane.b32.xlu0 %v751_v44, %s1792_s3 }
 0xaae   :  { %v813_v31 = vpop.permute.xlu1 %812 }
 0xaaf   :  { %v2076_v49 = vadd.f32 %v813_v31, %v805_v47 }
 0xab1   :  { %1570 = vtanh.f32 %v2076_v49 }
 0xab7   :  { %v1571_v50 = vpop.eup %1570 }
 0xab8   :  { %818 = vrot.lane.b32.xlu0 %v1571_v50, %s1791_s25 }
 0xac2   :  { %v754_v37 = vpop.permute.xlu0 %753 }
 0xac3   :  { %v2081_v29 = vadd.f32 %v754_v37, %v746_v51  ;;  %v1057_v51 = vld [vmem:[#allocation2 + $0xc] sm:$0x3] }
 0xac5   :  { %1572 = vtanh.f32 %v2081_v29 }
 0xacb   :  { %v1573_v52 = vpop.eup %1572 }
 0xacc   :  { %759 = vrot.lane.b32.xlu2 %v1573_v52, %s1791_s25 }
 0xb26   :  { %v760_v46 = vpop.permute.xlu2 %759 }
 0xb27   :  { %v762_v45 = vmul.f32 %v760_v46, %v743_v43 }
 0xb29   :  { %823 = vrot.lane.b32.xlu1 %v762_v45, %s1792_s3 }
 0xb2a   :  { %v819_v53 = vpop.permute.xlu0 %818 }
 0xb2b   :  { %v821_v54 = vmul.f32 %v819_v53, %v802_v20 }
 0xb2d   :  { %848 = vrot.lane.b32.xlu2 %v821_v54, %s1792_s3 }
 0xb87   :  { %v849_v55 = vpop.permute.xlu2 %848 }
 0xb88   :  { %1469 = vmatmul.msk.f32.vlgmr.msra.gmra.mxu0 %vm177_vm6, %v849_v55  ;;  %1471 = vmatmul.msk.f32.vlgmr.msrb.gmra.mxu1 %vm177_vm6, %v849_v55 }
 0xb89   :  { %1305 = vmatpush.msrb.mxu1 %v1909_v33  ;;  %1280 = vmatpush.msra.mxu0 %v1911_v34  ;;  %v910_v33 = vld [vmem:[#allocation2 + $0xa] sm:$0x3] }
 0xb8b   :  { %1306 = vmatpush.msrb.mxu1 %v1913_v35  ;;  %1281 = vmatpush.msra.mxu0 %v1917_v36 }
 0xb8d   :  { %1307 = vmatpush.msrb.mxu1 %v1925_v39  ;;  %1282 = vmatpush.msra.mxu0 %v1922_v38 }
 0xb8f   :  { %1308 = vmatpush.msrb.mxu1 %v1932_v41  ;;  %1283 = vmatpush.msra.mxu0 %v1930_v40 }
 0xb9b   :  { %v824_v42 = vpop.permute.xlu1 %823 }
 0xb9c   :  { %1468 = vmatmul.msk.f32.vlgmr.msrb.gmra.mxu3 %vm177_vm6, %v824_v42 }
 0xb9d   :  { %1217 = vmatpush.msrb.mxu3 %v1875_v2 }
 0xb9f   :  { %1218 = vmatpush.msrb.mxu3 %v1878_v3 }
 0xba1   :  { %1219 = vmatpush.msrb.mxu3 %v1881_v4 }
 0xba3   :  { %1220 = vmatpush.msrb.mxu3 %v1885_v5 }
 0xc05   :  { %v928_v34 = vpop.f32.mrf.mxu1  ;;  %v869_v38 = vpop.f32.mrf.mxu0 }
 0xc06   :  { %v931_v35 = vadd.f32 %v928_v34, %v910_v33 }
 0xc08   :  { %1574 = vtanh.f32 %v931_v35  ;;  %v1472_v3 = vmul.f32 -1.442695, %v931_v35 }
 0xc0e   :  { %v1575_v36 = vpop.eup %1574 }
 0xc0f   :  { %954 = vrot.lane.b32.xlu1 %v1575_v36, %s1791_s25 }
 0xc1f   :  { %v844_v39 = vpop.f32.mrf.mxu3 }
 0xc20   :  { %v870_v40 = vadd.f32 %v869_v38, %v844_v39 }
 0xc22   :  { %v872_v41 = vadd.f32 %v1973_v48, %v870_v40 }
 0xc24   :  { %1576 = vtanh.f32 %v872_v41  ;;  %v1470_v58 = vmul.f32 -1.442695, %v872_v41 }
 0xc25   :  { %1578 = vpow2.f32 %v1472_v3 }
 0xc2a   :  { %v1577_v2 = vpop.eup %1576 }
 0xc2b   :  { %895 = vrot.lane.b32.xlu0 %v1577_v2, %s1791_s25  ;;  %v1579_v4 = vpop.eup %1578 }
 0xc2c   :  { %v935_v5 = vadd.f32 1.0, %v1579_v4 }
 0xc2e   :  { %1580 = vrcp.f32 %v935_v5  ;;  %v947_v63 = vand.u32 2147483648, %v935_v5  ;;  %vm941_vm10 = vweird.f32 %v935_v5  ;;  %v945_v0 = vand.u32 2147483647, %v935_v5 }
 0xc2f   :  { %1582 = vpow2.f32 %v1470_v58 }
 0xc30   :  { %v948_v7 = vor.u32 1.1754944e-38, %v947_v63  ;;  %vm946_vm12 = vcmp.eq.f32.partialorder %v945_v0, 8.507059e+37 }
 0xc34   :  { %v1581_v56 = vpop.eup %1580 }
 0xc35   :  { %v937_v57 = vmul.f32 %v1581_v56, %v935_v5  ;;  %v1583_v61 = vpop.eup %1582  ;;  %vm942_vm9 = vweird.f32 %v1581_v56 }
 0xc36   :  { %v876_v1 = vadd.f32 1.0, %v1583_v61  ;;  %vm943_vm11 = vmor %vm941_vm10, %vm942_vm9 }
 0xc37   :  { %v938_v59 = vsub.f32 1.0, %v937_v57 }
 0xc38   :  { %1584 = vrcp.f32 %v876_v1  ;;  %v888_v16 = vand.u32 2147483648, %v876_v1  ;;  %vm882_vm14 = vweird.f32 %v876_v1  ;;  %v886_v17 = vand.u32 2147483647, %v876_v1 }
 0xc39   :  { %v939_v60 = vmul.f32 %v1581_v56, %v938_v59 }
 0xc3a   :  { %v889_v19 = vor.u32 1.1754944e-38, %v888_v16  ;;  %vm887_vm0 = vcmp.eq.f32.partialorder %v886_v17, 8.507059e+37 }
 0xc3b   :  { %v940_v62 = vadd.f32 %v1581_v56, %v939_v60 }
 0xc3d   :  { %v944_v6 = vsel %vm943_vm11, %v1581_v56, %v940_v62 }
 0xc3e   :  { %v949_v9 = vsel %vm946_vm12, %v948_v7, %v944_v6  ;;  %v1585_v11 = vpop.eup %1584 }
 0xc3f   :  { %v878_v12 = vmul.f32 %v1585_v11, %v876_v1  ;;  %vm883_vm13 = vweird.f32 %v1585_v11  ;;  %v952_v23 = vmul.f32 %v949_v9, %v2076_v49 }
 0xc40   :  { %vm884_vm15 = vmor %vm882_vm14, %vm883_vm13 }
 0xc41   :  { %v879_v13 = vsub.f32 1.0, %v878_v12 }
 0xc43   :  { %v880_v14 = vmul.f32 %v1585_v11, %v879_v13 }
 0xc45   :  { %v881_v15 = vadd.f32 %v1585_v11, %v880_v14 }
 0xc47   :  { %v885_v18 = vsel %vm884_vm15, %v1585_v11, %v881_v15 }
 0xc48   :  { %v890_v21 = vsel %vm887_vm0, %v889_v19, %v885_v18 }
 0xc49   :  { %v893_v26 = vmul.f32 %v890_v21, %v2081_v29 }
 0xc81   :  { %v955_v8 = vpop.permute.xlu1 %954 }
 0xc82   :  { %v957_v10 = vmul.f32 %v955_v8, %v949_v9 }
 0xc84   :  { %959 = vrot.lane.b32.xlu0 %v957_v10, %s1792_s3 }
 0xc9d   :  { %v896_v20 = vpop.permute.xlu0 %895 }
 0xc9e   :  { %v898_v22 = vmul.f32 %v896_v20, %v890_v21 }
 0xca0   :  { %900 = vrot.lane.b32.xlu2 %v898_v22, %s1792_s3 }
 0xcf6   :  { %v960_v24 = vpop.permute.xlu0 %959 }
 0xcf7   :  { %v2108_v25 = vadd.f32 %v960_v24, %v952_v23 }
 0xcf9   :  { %1586 = vtanh.f32 %v2108_v25 }
 0xcfa   :  { %v901_v27 = vpop.permute.xlu2 %900 }
 0xcfb   :  { %v2112_v28 = vadd.f32 %v901_v27, %v893_v26  ;;  %v1204_v26 = vld [vmem:[#allocation2 + $0xe] sm:$0x3] }
 0xcfd   :  { %1588 = vtanh.f32 %v2112_v28 }
 0xcff   :  { %v1587_v30 = vpop.eup %1586 }
 0xd00   :  { %965 = vrot.lane.b32.xlu2 %v1587_v30, %s1791_s25 }
 0xd03   :  { %v1589_v32 = vpop.eup %1588 }
 0xd04   :  { %906 = vrot.lane.b32.xlu1 %v1589_v32, %s1791_s25 }
 0xd5a   :  { %v966_v43 = vpop.permute.xlu2 %965 }
 0xd5b   :  { %v968_v44 = vmul.f32 %v966_v43, %v949_v9 }
 0xd5d   :  { %995 = vrot.lane.b32.xlu1 %v968_v44, %s1792_s3 }
 0xd76   :  { %v907_v47 = vpop.permute.xlu1 %906 }
 0xd77   :  { %v909_v31 = vmul.f32 %v907_v47, %v890_v21 }
 0xd79   :  { %970 = vrot.lane.b32.xlu0 %v909_v31, %s1792_s3  ;;  %v2146_v31 = vld [vmem:[%s2181_s6] ss:$0 sm:$0xff] }
 0xdcf   :  { %v996_v49 = vpop.permute.xlu1 %995 }
 0xdd0   :  { %1474 = vmatmul.msk.f32.vlgmr.msra.gmra.mxu3 %vm177_vm6, %v996_v49  ;;  %1476 = vmatmul.msk.f32.vlgmr.msrb.gmra.mxu0 %vm177_vm6, %v996_v49 }
 0xdeb   :  { %v971_v50 = vpop.permute.xlu0 %970 }
 0xdec   :  { %1473 = vmatmul.msk.f32.vlgmr.msra.gmra.mxu2 %vm177_vm6, %v971_v50 }
 0xe4d   :  { %v1075_v37 = vpop.f32.mrf.mxu0 }
 0xe4e   :  { %v1078_v29 = vadd.f32 %v1075_v37, %v1057_v51 }
 0xe50   :  { %1590 = vtanh.f32 %v1078_v29  ;;  %v1477_v42 = vmul.f32 -1.442695, %v1078_v29 }
 0xe53   :  { %v1016_v46 = vpop.f32.mrf.mxu3 }
 0xe56   :  { %v1591_v52 = vpop.eup %1590 }
 0xe57   :  { %1101 = vrot.lane.b32.xlu2 %v1591_v52, %s1791_s25 }
 0xe6f   :  { %v991_v45 = vpop.f32.mrf.mxu2 }
 0xe70   :  { %v1017_v53 = vadd.f32 %v1016_v46, %v991_v45 }
 0xe72   :  { %v1019_v54 = vadd.f32 %v1973_v48, %v1017_v53 }
 0xe74   :  { %1592 = vtanh.f32 %v1019_v54  ;;  %v1475_v57 = vmul.f32 -1.442695, %v1019_v54 }
 0xe75   :  { %1594 = vpow2.f32 %v1477_v42 }
 0xe7a   :  { %v1593_v55 = vpop.eup %1592 }
 0xe7b   :  { %1042 = vrot.lane.b32.xlu0 %v1593_v55, %s1791_s25  ;;  %v1595_v33 = vpop.eup %1594 }
 0xe7c   :  { %v1082_v34 = vadd.f32 1.0, %v1595_v33 }
 0xe7e   :  { %1596 = vrcp.f32 %v1082_v34  ;;  %v1094_v41 = vand.u32 2147483648, %v1082_v34  ;;  %vm1088_vm2 = vweird.f32 %v1082_v34  ;;  %v1092_v2 = vand.u32 2147483647, %v1082_v34 }
 0xe7f   :  { %1598 = vpow2.f32 %v1475_v57 }
 0xe80   :  { %v1095_v3 = vor.u32 1.1754944e-38, %v1094_v41  ;;  %vm1093_vm4 = vcmp.eq.f32.partialorder %v1092_v2, 8.507059e+37 }
 0xe84   :  { %v1597_v35 = vpop.eup %1596 }
 0xe85   :  { %v1084_v36 = vmul.f32 %v1597_v35, %v1082_v34  ;;  %vm1089_vm1 = vweird.f32 %v1597_v35  ;;  %v1599_v58 = vpop.eup %1598 }
 0xe86   :  { %vm1090_vm3 = vmor %vm1088_vm2, %vm1089_vm1  ;;  %v1023_v59 = vadd.f32 1.0, %v1599_v58 }
 0xe87   :  { %v1085_v38 = vsub.f32 1.0, %v1084_v36 }
 0xe88   :  { %1600 = vrcp.f32 %v1023_v59  ;;  %v1035_v1 = vand.u32 2147483648, %v1023_v59  ;;  %vm1029_vm7 = vweird.f32 %v1023_v59  ;;  %v1033_v6 = vand.u32 2147483647, %v1023_v59 }
 0xe89   :  { %v1086_v39 = vmul.f32 %v1597_v35, %v1085_v38 }
 0xe8a   :  { %v1036_v8 = vor.u32 1.1754944e-38, %v1035_v1  ;;  %vm1034_vm9 = vcmp.eq.f32.partialorder %v1033_v6, 8.507059e+37 }
 0xe8b   :  { %v1087_v40 = vadd.f32 %v1597_v35, %v1086_v39 }
 0xe8d   :  { %v1091_v48 = vsel %vm1090_vm3, %v1597_v35, %v1087_v40 }
 0xe8e   :  { %v1096_v5 = vsel %vm1093_vm4, %v1095_v3, %v1091_v48  ;;  %v1601_v60 = vpop.eup %1600 }
 0xe8f   :  { %v1025_v61 = vmul.f32 %v1601_v60, %v1023_v59  ;;  %vm1030_vm5 = vweird.f32 %v1601_v60  ;;  %v1099_v12 = vmul.f32 %v1096_v5, %v2108_v25 }
 0xe90   :  { %vm1031_vm8 = vmor %vm1029_vm7, %vm1030_vm5 }
 0xe91   :  { %v1026_v62 = vsub.f32 1.0, %v1025_v61 }
 0xe93   :  { %v1027_v63 = vmul.f32 %v1601_v60, %v1026_v62 }
 0xe95   :  { %v1028_v0 = vadd.f32 %v1601_v60, %v1027_v63 }
 0xe97   :  { %v1032_v7 = vsel %vm1031_vm8, %v1601_v60, %v1028_v0 }
 0xe98   :  { %v1037_v10 = vsel %vm1034_vm9, %v1036_v8, %v1032_v7 }
 0xe99   :  { %v1040_v16 = vmul.f32 %v1037_v10, %v2112_v28 }
 0xeb1   :  { %v1102_v4 = vpop.permute.xlu2 %1101 }
 0xeb2   :  { %v1104_v56 = vmul.f32 %v1102_v4, %v1096_v5 }
 0xeb4   :  { %1106 = vrot.lane.b32.xlu1 %v1104_v56, %s1792_s3 }
 0xeed   :  { %v1043_v9 = vpop.permute.xlu0 %1042 }
 0xeee   :  { %v1045_v11 = vmul.f32 %v1043_v9, %v1037_v10 }
 0xef0   :  { %1047 = vrot.lane.b32.xlu2 %v1045_v11, %s1792_s3 }
 0xf26   :  { %v1107_v13 = vpop.permute.xlu1 %1106 }
 0xf27   :  { %v2128_v14 = vadd.f32 %v1107_v13, %v1099_v12 }
 0xf29   :  { %1602 = vtanh.f32 %v2128_v14 }
 0xf2f   :  { %v1603_v15 = vpop.eup %1602 }
 0xf30   :  { %1112 = vrot.lane.b32.xlu0 %v1603_v15, %s1791_s25 }
 0xf4a   :  { %v1048_v17 = vpop.permute.xlu2 %1047 }
 0xf4b   :  { %v2133_v18 = vadd.f32 %v1048_v17, %v1040_v16 }
 0xf4d   :  { %1604 = vtanh.f32 %v2133_v18 }
 0xf53   :  { %v1605_v19 = vpop.eup %1604 }
 0xf54   :  { %1053 = vrot.lane.b32.xlu1 %v1605_v19, %s1791_s25 }
 0xfa2   :  { %v1113_v20 = vpop.permute.xlu0 %1112 }
 0xfa3   :  { %v1115_v21 = vmul.f32 %v1113_v20, %v1096_v5 }
 0xfa5   :  { %1142 = vrot.lane.b32.xlu2 %v1115_v21, %s1792_s3 }
 0xfc6   :  { %v1054_v22 = vpop.permute.xlu1 %1053 }
 0xfc7   :  { %v1056_v23 = vmul.f32 %v1054_v22, %v1037_v10 }
 0xfc9   :  { %1117 = vrot.lane.b32.xlu0 %v1056_v23, %s1792_s3 }
 0xfff   :  { %v1143_v24 = vpop.permute.xlu2 %1142 }
0x1000   :  { %1479 = vmatmul.msk.f32.vlgmr.msrb.gmra.mxu2 %vm177_vm6, %v1143_v24  ;;  %1481 = vmatmul.msk.f32.vlgmr.msrb.gmra.mxu3 %vm177_vm6, %v1143_v24 }
0x103b   :  { %v1118_v25 = vpop.permute.xlu0 %1117 }
0x103c   :  { %1478 = vmatmul.msk.f32.vlgmr.msra.gmra.mxu1 %vm177_vm6, %v1118_v25 }
0x1083   :  { %v1222_v27 = vpop.f32.mrf.mxu3  ;;  %v1163_v32 = vpop.f32.mrf.mxu2 }
0x1084   :  { %v1225_v28 = vadd.f32 %v1222_v27, %v1204_v26 }
0x1086   :  { %1606 = vtanh.f32 %v1225_v28  ;;  %v1482_v43 = vmul.f32 -1.442695, %v1225_v28 }
0x1088   :  { %1608 = vpow2.f32 %v1482_v43 }
0x108c   :  { %v1607_v30 = vpop.eup %1606 }
0x108d   :  { %1248 = vrot.lane.b32.xlu2 %v1607_v30, %s1791_s25 }
0x108e   :  { %v1609_v50 = vpop.eup %1608 }
0x108f   :  { %v1229_v37 = vadd.f32 1.0, %v1609_v50 }
0x1091   :  { %v1241_v54 = vand.u32 2147483648, %v1229_v37  ;;  %vm1235_vm11 = vweird.f32 %v1229_v37  ;;  %v1239_v55 = vand.u32 2147483647, %v1229_v37 }
0x1093   :  { %v1242_v33 = vor.u32 1.1754944e-38, %v1241_v54  ;;  %vm1240_vm13 = vcmp.eq.f32.partialorder %v1239_v55, 8.507059e+37 }
0x10b9   :  { %v1138_v44 = vpop.f32.mrf.mxu1 }
0x10ba   :  { %v1164_v47 = vadd.f32 %v1163_v32, %v1138_v44 }
0x10bc   :  { %v1166_v49 = vadd.f32 %v2146_v31, %v1164_v47 }
0x10be   :  { %1610 = vtanh.f32 %v1166_v49  ;;  %v1480_v38 = vmul.f32 -1.442695, %v1166_v49 }
0x10bf   :  { %1612 = vrcp.f32 %v1229_v37 }
0x10c0   :  { %1614 = vpow2.f32 %v1480_v38  ;;  %v1395_v38 = vld [vmem:[#allocation11 + $0x50] sm:$0xff] }
0x10c4   :  { %v1611_v51 = vpop.eup %1610 }
0x10c5   :  { %1189 = vrot.lane.b32.xlu1 %v1611_v51, %s1791_s25  ;;  %v1613_v29 = vpop.eup %1612 }
0x10c6   :  { %v1231_v52 = vmul.f32 %v1613_v29, %v1229_v37  ;;  %vm1236_vm10 = vweird.f32 %v1613_v29  ;;  %v1615_v39 = vpop.eup %1614 }
0x10c7   :  { %vm1237_vm12 = vmor %vm1235_vm11, %vm1236_vm10  ;;  %v1170_v40 = vadd.f32 1.0, %v1615_v39  ;;  %v1394_v39 = vld [vmem:[#allocation11 + $0x48] sm:$0xff] }
0x10c8   :  { %v1232_v46 = vsub.f32 1.0, %v1231_v52  ;;  %v1354_v52 = vld [vmem:[#allocation9 + $0x18] sm:$0xff] }
0x10c9   :  { %1616 = vrcp.f32 %v1170_v40  ;;  %v1182_v5 = vand.u32 2147483648, %v1170_v40  ;;  %vm1176_vm15 = vweird.f32 %v1170_v40  ;;  %v1180_v56 = vand.u32 2147483647, %v1170_v40  ;;  %1376 = vmatpush.msra.mxu2 %v1354_v52 }
0x10ca   :  { %v1233_v45 = vmul.f32 %v1613_v29, %v1232_v46  ;;  %v1353_v46 = vld [vmem:[#allocation9 + $0x10] sm:$0xff] }
0x10cb   :  { %v1183_v58 = vor.u32 1.1754944e-38, %v1182_v5  ;;  %vm1181_vm1 = vcmp.eq.f32.partialorder %v1180_v56, 8.507059e+37  ;;  %1377 = vmatpush.msra.mxu2 %v1353_v46  ;;  %v1387_v56 = vld [vmem:[#allocation11 + $0x10] sm:$0xff] }
0x10cc   :  { %v1234_v53 = vadd.f32 %v1613_v29, %v1233_v45  ;;  %v1352_v45 = vld [vmem:[#allocation9 + $0x8] sm:$0xff] }
0x10cd   :  { %1378 = vmatpush.msra.mxu2 %v1352_v45 }
0x10ce   :  { %v1238_v42 = vsel %vm1237_vm12, %v1613_v29, %v1234_v53  ;;  %v1351_v53 = vld [vmem:[#allocation9] sm:$0xff] }
0x10cf   :  { %v1243_v35 = vsel %vm1240_vm13, %v1242_v33, %v1238_v42  ;;  %v1617_v41 = vpop.eup %1616  ;;  %1379 = vmatpush.msra.mxu2 %v1351_v53  ;;  %v1400_v42 = vld [vmem:[#allocation11 + $0x78] sm:$0xff]  ;;  %v1399_v33 = vld [vmem:[#allocation11 + $0x70] sm:$0xff] }
0x10d0   :  { %v1172_v2 = vmul.f32 %v1617_v41, %v1170_v40  ;;  %vm1177_vm14 = vweird.f32 %v1617_v41  ;;  %v1246_v62 = vmul.f32 %v1243_v35, %v2128_v14  ;;  %1405 = vmatpush.msra.mxu3 %v1400_v42  ;;  %v1393_v40 = vld [vmem:[#allocation11 + $0x40] sm:$0xff] }
0x10d1   :  { %vm1178_vm0 = vmor %vm1176_vm15, %vm1177_vm14 }
0x10d2   :  { %v1173_v48 = vsub.f32 1.0, %v1172_v2  ;;  %1406 = vmatpush.msra.mxu3 %v1399_v33  ;;  %v1391_v2 = vld [vmem:[#allocation11 + $0x30] sm:$0xff] }
0x10d4   :  { %v1174_v3 = vmul.f32 %v1617_v41, %v1173_v48  ;;  %v1390_v48 = vld [vmem:[#allocation11 + $0x28] sm:$0xff] }
0x10d6   :  { %v1175_v4 = vadd.f32 %v1617_v41, %v1174_v3  ;;  %v1389_v3 = vld [vmem:[#allocation11 + $0x20] sm:$0xff] }
0x10d8   :  { %v1179_v57 = vsel %vm1178_vm0, %v1617_v41, %v1175_v4  ;;  %v1392_v41 = vld [vmem:[#allocation11 + $0x38] sm:$0xff] }
0x10d9   :  { %v1184_v60 = vsel %vm1181_vm1, %v1183_v58, %v1179_v57  ;;  %v1388_v4 = vld [vmem:[#allocation11 + $0x18] sm:$0xff]  ;;  %v1386_v57 = vld [vmem:[#allocation11 + $0x8] sm:$0xff]  ;;  %v1385_v58 = vld [vmem:[#allocation11] sm:$0xff] }
0x10da   :  { %v1187_v6 = vmul.f32 %v1184_v60, %v2133_v18 }
0x10e7   :  { %v1249_v34 = vpop.permute.xlu2 %1248 }
0x10e8   :  { %v1251_v36 = vmul.f32 %v1249_v34, %v1243_v35  ;;  %v1398_v34 = vld [vmem:[#allocation11 + $0x68] sm:$0xff] }
0x10e9   :  { %1407 = vmatpush.msra.mxu3 %v1398_v34 }
0x10ea   :  { %1253 = vrot.lane.b32.xlu1 %v1251_v36, %s1792_s3  ;;  %v1396_v36 = vld [vmem:[#allocation11 + $0x58] sm:$0xff] }
0x1137   :  { %v1190_v59 = vpop.permute.xlu1 %1189 }
0x1138   :  { %v1192_v61 = vmul.f32 %v1190_v59, %v1184_v60  ;;  %v1500_v59 = vld [vmem:[%s2183_s8] ss:$0 sm:$0xff] }
0x113a   :  { %1194 = vrot.lane.b32.xlu0 %v1192_v61, %s1792_s3 }
0x115c   :  { %v1254_v63 = vpop.permute.xlu1 %1253 }
0x115d   :  { %v1256_v0 = vadd.f32 %v1254_v63, %v1246_v62  ;;  %v1501_v63 = vld [vmem:[%s2185_s10] ss:$0 sm:$0xff] }
0x115f   :  { %1618 = vtanh.f32 %v1256_v0 }
0x1165   :  { %v1619_v1 = vpop.eup %1618 }
0x1166   :  { %1259 = vrot.lane.b32.xlu0 %v1619_v1, %s1791_s25 }
0x11ac   :  { %v1195_v7 = vpop.permute.xlu0 %1194 }
0x11ad   :  { %v1197_v8 = vadd.f32 %v1195_v7, %v1187_v6 }
0x11af   :  { %1620 = vtanh.f32 %v1197_v8 }
0x11b5   :  { %v1621_v9 = vpop.eup %1620 }
0x11b6   :  { %1200 = vrot.lane.b32.xlu2 %v1621_v9, %s1791_s25 }
0x11d8   :  { %v1260_v10 = vpop.permute.xlu0 %1259 }
0x11d9   :  { %v1262_v11 = vmul.f32 %v1260_v10, %v1243_v35  ;;  %v1397_v35 = vld [vmem:[#allocation11 + $0x60] sm:$0xff] }
0x11da   :  { %1408 = vmatpush.msra.mxu3 %v1397_v35 }
0x11db   :  { %1289 = vrot.lane.b32.xlu2 %v1262_v11, %s1792_s3 }
0x11dc   :  { %1409 = vmatpush.msra.mxu3 %v1396_v36 }
0x11de   :  { %1410 = vmatpush.msra.mxu3 %v1395_v38 }
0x11e0   :  { %1411 = vmatpush.msra.mxu3 %v1394_v39 }
0x11e2   :  { %1412 = vmatpush.msra.mxu3 %v1393_v40 }
0x11e4   :  { %1413 = vmatpush.msra.mxu3 %v1392_v41 }
0x11e6   :  { %1414 = vmatpush.msra.mxu3 %v1391_v2 }
0x11e8   :  { %1415 = vmatpush.msra.mxu3 %v1390_v48 }
0x11ea   :  { %1416 = vmatpush.msra.mxu3 %v1389_v3 }
0x11ec   :  { %1417 = vmatpush.msra.mxu3 %v1388_v4 }
0x11ee   :  { %1418 = vmatpush.msra.mxu3 %v1387_v56 }
0x11f0   :  { %1419 = vmatpush.msra.mxu3 %v1386_v57 }
0x11f2   :  { %1420 = vmatpush.msra.mxu3 %v1385_v58 }
0x1210   :  { %v1201_v12 = vpop.permute.xlu2 %1200 }
0x1211   :  { %v1203_v13 = vmul.f32 %v1201_v12, %v1184_v60 }
0x1213   :  { %1264 = vrot.lane.b32.xlu1 %v1203_v13, %s1792_s3 }
0x1235   :  { %v1290_v14 = vpop.permute.xlu2 %1289 }
0x1236   :  { %1484 = vmatmul.msk.f32.vlgmr.msrb.gmra.mxu1 %vm177_vm6, %v1290_v14 }
0x1285   :  { %v1265_v15 = vpop.permute.xlu1 %1264 }
0x1286   :  { %1483 = vmatmul.msk.f32.vlgmr.msra.gmra.mxu0 %vm177_vm6, %v1265_v15 }
0x12b3   :  { %v1310_v16 = vpop.f32.mrf.mxu1 }
0x1303   :  { %v1285_v17 = vpop.f32.mrf.mxu0 }
0x1304   :  { %v1311_v18 = vadd.f32 %v1310_v16, %v1285_v17 }
0x1306   :  { %v1313_v19 = vadd.f32 %v2146_v31, %v1311_v18 }
0x1308   :  { %1622 = vtanh.f32 %v1313_v19  ;;  %v1485_v21 = vmul.f32 -1.442695, %v1313_v19 }
0x130a   :  { %1624 = vpow2.f32 %v1485_v21 }
0x130e   :  { %v1623_v20 = vpop.eup %1622 }
0x130f   :  { %1336 = vrot.lane.b32.xlu0 %v1623_v20, %s1791_s25 }
0x1310   :  { %v1625_v22 = vpop.eup %1624 }
0x1311   :  { %v1317_v23 = vadd.f32 1.0, %v1625_v22 }
0x1313   :  { %1626 = vrcp.f32 %v1317_v23  ;;  %v1329_v30 = vand.u32 2147483648, %v1317_v23  ;;  %vm1323_vm3 = vweird.f32 %v1317_v23  ;;  %v1327_v32 = vand.u32 2147483647, %v1317_v23 }
0x1315   :  { %v1330_v44 = vor.u32 1.1754944e-38, %v1329_v30  ;;  %vm1328_vm5 = vcmp.eq.f32.partialorder %v1327_v32, 8.507059e+37 }
0x1319   :  { %v1627_v24 = vpop.eup %1626 }
0x131a   :  { %v1319_v25 = vmul.f32 %v1627_v24, %v1317_v23  ;;  %vm1324_vm2 = vweird.f32 %v1627_v24 }
0x131b   :  { %vm1325_vm4 = vmor %vm1323_vm3, %vm1324_vm2 }
0x131c   :  { %v1320_v26 = vsub.f32 1.0, %v1319_v25 }
0x131e   :  { %v1321_v27 = vmul.f32 %v1627_v24, %v1320_v26 }
0x1320   :  { %v1322_v28 = vadd.f32 %v1627_v24, %v1321_v27 }
0x1322   :  { %v1326_v43 = vsel %vm1325_vm4, %v1627_v24, %v1322_v28 }
0x1323   :  { %v1331_v31 = vsel %vm1328_vm5, %v1330_v44, %v1326_v43 }
0x1324   :  { %v1334_v50 = vmul.f32 %v1331_v31, %v1197_v8 }
0x1381   :  { %v1337_v47 = vpop.permute.xlu0 %1336 }
0x1382   :  { %v1339_v49 = vmul.f32 %v1337_v47, %v1331_v31 }
0x1384   :  { %1341 = vrot.lane.b32.xlu1 %v1339_v49, %s1792_s3 }
0x13f6   :  { %v1342_v51 = vpop.permute.xlu1 %1341 }
0x13f7   :  { %v1344_v37 = vadd.f32 %v1342_v51, %v1334_v50 }
0x13f9   :  { %1628 = vtanh.f32 %v1344_v37 }
0x13ff   :  { %v1629_v29 = vpop.eup %1628 }
0x1400   :  { %1347 = vrot.lane.b32.xlu2 %v1629_v29, %s1791_s25 }
0x145a   :  { %v1348_v54 = vpop.permute.xlu2 %1347 }
0x145b   :  { %v1350_v55 = vmul.f32 %v1348_v54, %v1331_v31 }
0x145d   :  { %1360 = vrot.lane.b32.xlu0 %v1350_v55, %s1792_s3 }
0x14cf   :  { %v1361_v5 = vpop.permute.xlu0 %1360 }
0x14d0   :  { %1486 = vmatmul.msk.f32.vlgmr.msra.gmra.mxu2 %vm177_vm6, %v1361_v5 }
0x1553   :  { %v1381_v60 = vpop.f32.mrf.mxu2 }
0x1554   :  { %v1382_v61 = vadd.f32 %v1500_v59, %v1381_v60 }
0x1556   :  { %v1384_v62 = vmax.f32 %v1382_v61, 0.0 }
0x1558   :  { %1421 = vmatmul.f32.vlgmr.msra.gmra.mxu3 %v1384_v62 }
0x15db   :  { %v1422_v0 = vpop.f32.mrf.mxu3 }
0x15dc   :  { %v1423_v1 = vadd.f32 %v1501_v63, %v1422_v0 }
0x15de   :  { %1425 = vst [vmem:[#allocation12] sm:$0x3] %v1423_v1 }
0x15df   :  { %1436 = dma.vmem_to_hbm [thread:$0]  %s1432_s15, 32, %s1434_s17, [#allocation5]  }
0x15e0   :  { %1781 = dma.done.wait [#allocation5], 32  }
0x15e1   :  { %1782 = vsyncadd [#allocation5], 4294967264 }
0x15e2   :  { %1441 = vsyncpa [#allocation4], 1 }
0x15e3   :  { %1442 = vsyncpa [#allocation7], 1 }
0x15e4   :  { %1443 = vsyncpa [#allocation10], 1 }
0x15e5   :  { %1444 = vsyncpa [#allocation5], 1 }

</bundles_post_ra>
